<compile_context>
chip_gen: v7x
topology: tpu7x:2x2x1
jax: 0.10.0
libtpu: 0.0.40
codegen_flags: <defaults>
</compile_context>

<pallas_src>
import numpy as np

import jax
import jax.numpy as jnp
from jax import lax
from jax.experimental import pallas as pl
from jax.experimental.pallas import tpu as pltpu

WIN_SIZE = 11
WIN_SIGMA = 1.5
DATA_RANGE = 1.0
K1, K2 = 0.01, 0.03
C1 = (K1 * DATA_RANGE) ** 2
C2 = (K2 * DATA_RANGE) ** 2

_MM = dict(preferred_element_type=jnp.float32,
           precision=lax.Precision.HIGHEST)


def _gaussian_window_1d(size, sigma):
    # matches pytorch_msssim._fspecial_gauss_1d
    coords = np.arange(size, dtype=np.float64) - size // 2
    g = np.exp(-(coords ** 2) / (2.0 * sigma * sigma))
    return (g / g.sum()).astype(np.float32)


def _banded_filter_matrices(h, w):
    """Constant banded Gaussian matrices for the two MXU passes."""
    win = _gaussian_window_1d(WIN_SIZE, WIN_SIGMA)
    ho, wo = h - WIN_SIZE + 1, w - WIN_SIZE + 1
    gw = np.zeros((w, wo), np.float32)   # right-mul: out[:, j] = sum_k in[:, j+k]*win[k]
    gh = np.zeros((ho, h), np.float32)   # left-mul:  out[i, :] = sum_k in[i+k, :]*win[k]
    for k in range(WIN_SIZE):
        gw[np.arange(wo) + k, np.arange(wo)] = win[k]
        gh[np.arange(ho), np.arange(ho) + k] = win[k]
    return jnp.asarray(gw), jnp.asarray(gh)


def _images_per_block(nc, h, w, budget_bytes=10 * 1024 * 1024):
    """How many images to process per grid step, sized for a VMEM budget."""
    ho, wo = h - WIN_SIZE + 1, w - WIN_SIZE + 1
    # f32 live set per image: double-buffered x/y input blocks + stacked
    # signals + horizontal intermediates + filtered maps / SSIM temporaries.
    per_img = 4 * (4 * h * w + 5 * h * w + 5 * h * wo + 10 * ho * wo)
    g = max(1, min(nc, budget_bytes // max(per_img, 1)))
    # Prefer >= 2 grid blocks so v7x's two TensorCores both get work.
    if nc > 1:
        g = min(g, pl.cdiv(nc, 2))
    # TODO(synk): very large images (>= ~512x512) would additionally want
    # H-tiling with an 11-row halo to bound the per-step working set.
    return int(g)


def _ssim_kernel(gw_ref, gh_ref, x_ref, y_ref, o_ref):
    # gw_ref: (W, Wo)  banded Gaussian, right-multiply (horizontal / lanes)
    # gh_ref: (Ho, H)  banded Gaussian, left-multiply  (vertical / sublanes)
    # x_ref, y_ref: (1, G*H, W) block of G images stacked on sublanes
    # o_ref: (1, 1, G) per-image mean SSIM
    gw = gw_ref[...]
    gh = gh_ref[...]
    x = x_ref[0].astype(jnp.float32)
    y = y_ref[0].astype(jnp.float32)

    ho, h = gh.shape
    wo = gw.shape[1]
    g = x.shape[0] // h                                   # images per block

    # Five signals stacked along sublanes -> one big MXU matmul per pass.
    sig = jnp.concatenate([x, y, x * x, y * y, x * y], axis=0)   # (5*G*H, W)

    # Horizontal (lane) Gaussian as a right matmul on the MXU.
    hor = jnp.dot(sig, gw, **_MM)                                # (5*G*H, Wo)

    # Vertical (sublane) Gaussian as a batched left matmul on the MXU.
    hor3 = hor.reshape(5 * g, h, wo)                             # (5G, H, Wo)
    gh_b = jnp.broadcast_to(gh, (5 * g, ho, h))
    v = jnp.einsum('boh,bhw->bow', gh_b, hor3, **_MM)            # (5G, Ho, Wo)

    mu1 = v[0 * g:1 * g]
    mu2 = v[1 * g:2 * g]
    e_xx = v[2 * g:3 * g]
    e_yy = v[3 * g:4 * g]
    e_xy = v[4 * g:5 * g]

    mu1_sq = mu1 * mu1
    mu2_sq = mu2 * mu2
    mu1_mu2 = mu1 * mu2
    sigma1_sq = e_xx - mu1_sq
    sigma2_sq = e_yy - mu2_sq
    sigma12 = e_xy - mu1_mu2

    cs_map = (2.0 * sigma12 + C2) / (sigma1_sq + sigma2_sq + C2)
    ssim_map = ((2.0 * mu1_mu2 + C1) / (mu1_sq + mu2_sq + C1)) * cs_map

    # In-kernel spatial reduction -> one scalar per image (no HBM map).
    s = jnp.sum(ssim_map, axis=2)            # (G, Ho)
    s = jnp.sum(s, axis=1)                   # (G,)
    o_ref[...] = (s * (1.0 / (ho * wo))).reshape(1, 1, g)


def ssim_loss(output, target):
    """1 - SSIM(output, target); SSIM per pytorch_msssim defaults."""
    assert output.shape == target.shape and output.ndim == 4
    n, c, h, w = output.shape
    ho, wo = h - WIN_SIZE + 1, w - WIN_SIZE + 1
    assert ho > 0 and wo > 0, "spatial dims must be >= win_size (11)"

    nc = n * c
    x = output.reshape(nc, h, w)
    y = target.reshape(nc, h, w)

    g = _images_per_block(nc, h, w)
    num_blocks = pl.cdiv(nc, g)
    nc_pad = num_blocks * g
    if nc_pad != nc:
        pad = ((0, nc_pad - nc), (0, 0), (0, 0))
        x = jnp.pad(x, pad)          # zero pad-images are sliced off below
        y = jnp.pad(y, pad)

    # (num_blocks, G*H, W): each grid step sees G full images stacked on
    # sublanes.  Inputs keep their source dtype (kernel casts to f32).
    x = x.reshape(num_blocks, g * h, w)
    y = y.reshape(num_blocks, g * h, w)

    gw, gh = _banded_filter_matrices(h, w)

    per_image = pl.pallas_call(
        _ssim_kernel,
        out_shape=jax.ShapeDtypeStruct((num_blocks, 1, g), jnp.float32),
        grid=(num_blocks,),
        in_specs=[
            pl.BlockSpec((w, wo), lambda i: (0, 0)),         # constant filter
            pl.BlockSpec((ho, h), lambda i: (0, 0)),         # constant filter
            pl.BlockSpec((1, g * h, w), lambda i: (i, 0, 0)),
            pl.BlockSpec((1, g * h, w), lambda i: (i, 0, 0)),
        ],
        out_specs=pl.BlockSpec((1, 1, g), lambda i: (i, 0, 0)),
        compiler_params=pltpu.CompilerParams(
            dimension_semantics=("parallel",),
            vmem_limit_bytes=32 * 1024 * 1024,
        ),
    )(gw, gh, x, y)

    ssim_per_image = per_image.reshape(nc_pad)[:nc]
    # size_average=True: mean over spatial map per (n, c) (done in-kernel),
    # then over all (n, c).
    return 1.0 - jnp.mean(ssim_per_image)


def _ssim_loss_reference(output, target):
    """Pure-JAX reference (same math as pytorch_msssim) for a sanity check."""
    n, c, h, w = output.shape
    ho, wo = h - WIN_SIZE + 1, w - WIN_SIZE + 1
    win = jnp.asarray(_gaussian_window_1d(WIN_SIZE, WIN_SIGMA))
    x = output.reshape(n * c, h, w).astype(jnp.float32)
    y = target.reshape(n * c, h, w).astype(jnp.float32)

    def gfilter(img):
        hor = sum(win[k] * img[:, :, k:k + wo] for k in range(WIN_SIZE))
        return sum(win[k] * hor[:, k:k + ho, :] for k in range(WIN_SIZE))

    mu1, mu2 = gfilter(x), gfilter(y)
    s1 = gfilter(x * x) - mu1 * mu1
    s2 = gfilter(y * y) - mu2 * mu2
    s12 = gfilter(x * y) - mu1 * mu2
    cs = (2.0 * s12 + C2) / (s1 + s2 + C2)
    ssim = ((2.0 * mu1 * mu2 + C1) / (mu1 * mu1 + mu2 * mu2 + C1)) * cs
    return 1.0 - ssim.reshape(n * c, -1).mean(-1).mean()


if __name__ == "__main__":
    key = jax.random.PRNGKey(0)
    k1, k2 = jax.random.split(key)
    # NCHW, channel=3 (module default), values in [0, 1] (data_range=1)
    out_img = jax.random.uniform(k1, (2, 3, 16, 16), dtype=jnp.float32)
    tgt_img = jax.random.uniform(k2, (2, 3, 16, 16), dtype=jnp.float32)

    loss = jax.jit(ssim_loss)(out_img, tgt_img)
    jax.block_until_ready(loss)
    ref = _ssim_loss_reference(out_img, tgt_img)

    assert loss.shape == () and bool(jnp.isfinite(loss))
    assert abs(float(loss) - float(ref)) < 1e-2, (float(loss), float(ref))
    print("KERNEL_OK")
</pallas_src>

<mosaic_0001>
module attributes {stable_mosaic.version = 11 : i64} {
  func.func @_ssim_kernel(%arg0: i32, %arg1: memref<16x6xf32, #tpu.memory_space<vmem>>, %arg2: memref<6x16xf32, #tpu.memory_space<vmem>>, %arg3: memref<1x48x16xf32, #tpu.memory_space<vmem>>, %arg4: memref<1x48x16xf32, #tpu.memory_space<vmem>>, %arg5: memref<1x1x3xf32, #tpu.memory_space<vmem>>) attributes {dimension_semantics = [#tpu.dimension_semantics<parallel>], iteration_bounds = array<i64: 2>, scalar_prefetch = 0 : i64, scratch_operands = 0 : i64, tpu.core_type = #tpu.core_type<tc>, window_params = [{pipeline_mode = #tpu.pipeline_mode<synchronous>, transform_indices = @transform_0, window_bounds = array<i64: 16, 6>}, {pipeline_mode = #tpu.pipeline_mode<synchronous>, transform_indices = @transform_1, window_bounds = array<i64: 6, 16>}, {transform_indices = @transform_2, window_bounds = array<i64: 1, 48, 16>}, {transform_indices = @transform_3, window_bounds = array<i64: 1, 48, 16>}, {transform_indices = @transform_4, window_bounds = array<i64: 1, 1, 3>}]} {
    %c0 = arith.constant 0 : index
    %c0_0 = arith.constant 0 : index
    %0 = vector.load %arg1[%c0, %c0_0] : memref<16x6xf32, #tpu.memory_space<vmem>>, vector<16x6xf32>
    %c0_1 = arith.constant 0 : index
    %c0_2 = arith.constant 0 : index
    %1 = vector.load %arg2[%c0_1, %c0_2] : memref<6x16xf32, #tpu.memory_space<vmem>>, vector<6x16xf32>
    %c0_3 = arith.constant 0 : index
    %c0_4 = arith.constant 0 : index
    %c0_5 = arith.constant 0 : index
    %2 = vector.load %arg3[%c0_3, %c0_4, %c0_5] : memref<1x48x16xf32, #tpu.memory_space<vmem>>, vector<1x48x16xf32>
    %3 = vector.shape_cast %2 : vector<1x48x16xf32> to vector<48x16xf32>
    %c0_6 = arith.constant 0 : index
    %c0_7 = arith.constant 0 : index
    %c0_8 = arith.constant 0 : index
    %4 = vector.load %arg4[%c0_6, %c0_7, %c0_8] : memref<1x48x16xf32, #tpu.memory_space<vmem>>, vector<1x48x16xf32>
    %5 = vector.shape_cast %4 : vector<1x48x16xf32> to vector<48x16xf32>
    %6 = arith.mulf %3, %3 : vector<48x16xf32>
    %7 = arith.mulf %5, %5 : vector<48x16xf32>
    %8 = arith.mulf %3, %5 : vector<48x16xf32>
    %9 = tpu.concatenate %3, %5, %6, %7, %8 in 0 : vector<48x16xf32>, vector<48x16xf32>, vector<48x16xf32>, vector<48x16xf32>, vector<48x16xf32> -> vector<240x16xf32>
    %cst = arith.constant dense<0.000000e+00> : vector<240x6xf32>
    %10 = tpu.matmul %9, %0, %cst {dimension_numbers = #tpu.dot_dimension_numbers<[1], [0], [0], [1], [0, 0, 1, 1], [], []>, precision = #tpu.contract_precision<fp32>} : vector<240x16xf32>, vector<16x6xf32>, vector<240x6xf32> -> vector<240x6xf32>
    %11 = vector.shape_cast %10 : vector<240x6xf32> to vector<15x16x6xf32>
    %12 = vector.shape_cast %1 : vector<6x16xf32> to vector<1x6x16xf32>
    %13 = vector.broadcast %12 : vector<1x6x16xf32> to vector<15x6x16xf32>
    "tpu.trace_start"() <{level = 10 : i32, message = "boh,bhw->bow"}> : () -> ()
    %cst_9 = arith.constant dense<0.000000e+00> : vector<15x6x6xf32>
    %14 = tpu.matmul %13, %11, %cst_9 {dimension_numbers = #tpu.dot_dimension_numbers<[2], [1], [1], [2], [0, 0, 0, 1, 1, 2], [0], [0]>, precision = #tpu.contract_precision<fp32>} : vector<15x6x16xf32>, vector<15x16x6xf32>, vector<15x6x6xf32> -> vector<15x6x6xf32>
    "tpu.trace_stop"() : () -> ()
    %15 = vector.extract_strided_slice %14 {offsets = [0, 0, 0], sizes = [3, 6, 6], strides = [1, 1, 1]} : vector<15x6x6xf32> to vector<3x6x6xf32>
    %16 = vector.extract_strided_slice %14 {offsets = [3, 0, 0], sizes = [3, 6, 6], strides = [1, 1, 1]} : vector<15x6x6xf32> to vector<3x6x6xf32>
    %17 = vector.extract_strided_slice %14 {offsets = [6, 0, 0], sizes = [3, 6, 6], strides = [1, 1, 1]} : vector<15x6x6xf32> to vector<3x6x6xf32>
    %18 = vector.extract_strided_slice %14 {offsets = [9, 0, 0], sizes = [3, 6, 6], strides = [1, 1, 1]} : vector<15x6x6xf32> to vector<3x6x6xf32>
    %19 = vector.extract_strided_slice %14 {offsets = [12, 0, 0], sizes = [3, 6, 6], strides = [1, 1, 1]} : vector<15x6x6xf32> to vector<3x6x6xf32>
    %20 = arith.mulf %15, %15 : vector<3x6x6xf32>
    %21 = arith.mulf %16, %16 : vector<3x6x6xf32>
    %22 = arith.mulf %15, %16 : vector<3x6x6xf32>
    %23 = arith.subf %17, %20 : vector<3x6x6xf32>
    %24 = arith.subf %18, %21 : vector<3x6x6xf32>
    %25 = arith.subf %19, %22 : vector<3x6x6xf32>
    %cst_10 = arith.constant 2.000000e+00 : f32
    %26 = vector.broadcast %cst_10 : f32 to vector<3x6x6xf32>
    %27 = arith.mulf %26, %25 : vector<3x6x6xf32>
    %cst_11 = arith.constant 8.99999984E-4 : f32
    %28 = vector.broadcast %cst_11 : f32 to vector<3x6x6xf32>
    %29 = arith.addf %27, %28 : vector<3x6x6xf32>
    %30 = arith.addf %23, %24 : vector<3x6x6xf32>
    %cst_12 = arith.constant 8.99999984E-4 : f32
    %31 = vector.broadcast %cst_12 : f32 to vector<3x6x6xf32>
    %32 = arith.addf %30, %31 : vector<3x6x6xf32>
    %33 = arith.divf %29, %32 : vector<3x6x6xf32>
    %cst_13 = arith.constant 2.000000e+00 : f32
    %34 = vector.broadcast %cst_13 : f32 to vector<3x6x6xf32>
    %35 = arith.mulf %34, %22 : vector<3x6x6xf32>
    %cst_14 = arith.constant 9.99999974E-5 : f32
    %36 = vector.broadcast %cst_14 : f32 to vector<3x6x6xf32>
    %37 = arith.addf %35, %36 : vector<3x6x6xf32>
    %38 = arith.addf %20, %21 : vector<3x6x6xf32>
    %cst_15 = arith.constant 9.99999974E-5 : f32
    %39 = vector.broadcast %cst_15 : f32 to vector<3x6x6xf32>
    %40 = arith.addf %38, %39 : vector<3x6x6xf32>
    %41 = arith.divf %37, %40 : vector<3x6x6xf32>
    %42 = arith.mulf %41, %33 : vector<3x6x6xf32>
    %cst_16 = arith.constant dense<0.000000e+00> : vector<3x6xf32>
    %43 = vector.multi_reduction <add>, %42, %cst_16 [2] : vector<3x6x6xf32> to vector<3x6xf32>
    %cst_17 = arith.constant dense<0.000000e+00> : vector<3xf32>
    %44 = vector.multi_reduction <add>, %43, %cst_17 [1] : vector<3x6xf32> to vector<3xf32>
    %cst_18 = arith.constant 0.027777778 : f32
    %45 = vector.broadcast %cst_18 : f32 to vector<3xf32>
    %46 = arith.mulf %44, %45 : vector<3xf32>
    %47 = vector.shape_cast %46 : vector<3xf32> to vector<1x1x3xf32>
    %c0_19 = arith.constant 0 : index
    %c0_20 = arith.constant 0 : index
    %c0_21 = arith.constant 0 : index
    %48 = vector.load %arg5[%c0_19, %c0_20, %c0_21] : memref<1x1x3xf32, #tpu.memory_space<vmem>>, vector<1x1x3xf32>
    tpu.vector_store %arg5[%c0_19, %c0_20, %c0_21], %47 {strides = array<i32>} : memref<1x1x3xf32, #tpu.memory_space<vmem>>, vector<1x1x3xf32>,
    return
  }
  func.func @transform_0(%arg0: i32) -> (i32, i32) {
    %c0_i32 = arith.constant 0 : i32
    %c0_i32_0 = arith.constant 0 : i32
    %c0_i32_1 = arith.constant 0 : i32
    return %c0_i32, %c0_i32_0 : i32, i32
  }
  func.func @transform_1(%arg0: i32) -> (i32, i32) {
    %c0_i32 = arith.constant 0 : i32
    %c0_i32_0 = arith.constant 0 : i32
    %c0_i32_1 = arith.constant 0 : i32
    return %c0_i32, %c0_i32_0 : i32, i32
  }
  func.func @transform_2(%arg0: i32) -> (i32, i32, i32) {
    %c0_i32 = arith.constant 0 : i32
    %c0_i32_0 = arith.constant 0 : i32
    %c0_i32_1 = arith.constant 0 : i32
    return %arg0, %c0_i32, %c0_i32_0 : i32, i32, i32
  }
  func.func @transform_3(%arg0: i32) -> (i32, i32, i32) {
    %c0_i32 = arith.constant 0 : i32
    %c0_i32_0 = arith.constant 0 : i32
    %c0_i32_1 = arith.constant 0 : i32
    return %arg0, %c0_i32, %c0_i32_0 : i32, i32, i32
  }
  func.func @transform_4(%arg0: i32) -> (i32, i32, i32) {
    %c0_i32 = arith.constant 0 : i32
    %c0_i32_0 = arith.constant 0 : i32
    %c0_i32_1 = arith.constant 0 : i32
    return %arg0, %c0_i32, %c0_i32_0 : i32, i32, i32
  }
}

</mosaic_0001>

<bundles_post_ra>
// kernel: ssim_loss.1
= control target key start
LH: loop header
LB: loop body
LE: loop exit
PB: predicated region body
PF: predicated region fallthrough
CT: control target
= control target key end

     0   :  { %9 = vsyncpa [#allocation3], 0  ;;  %s12914_s0 = inlined_call_operand.vmem [shape: f32[16,6], index: 0, kind: input, shape index: {}]   ;;  %s12915_s1 = inlined_call_operand.vmem [shape: f32[6,16], index: 1, kind: input, shape index: {}]   ;;  %s12916_s2 = inlined_call_operand.hbm [shape: f32[2,48,16], index: 2, kind: input, shape index: {}]   ;;  %s12917_s3 = inlined_call_operand.hbm [shape: f32[2,48,16], index: 3, kind: input, shape index: {}]   ;;  %s12918_s4 = inlined_call_operand.vmem [shape: f32[2,1,3], index: 4, kind: output, shape index: {}]  }
   0x1   :  { %11 = vsyncpa [#allocation3 + $0x1], 0 }
   0x2   :  { %12 = vsyncpa [#allocation5], 0 }
   0x3   :  { %14 = vsyncpa [#allocation5 + $0x1], 0  ;;  %s11342_s15 = smov 0   ;;  %s11344_s16 = smov 0  }
   0x4   :  { %s11346_s17 = smov 0   ;;  %s11348_s18 = smov 0  }
   0x5 LB: > { %s11361_s19 = sadd.s32 4294967295, %s11308_s18   ;;  %s11364_s20 = sadd.s32 1, %s11308_s18   ;;  %s11308_s18 = sphi %s11348_s18, %s13143_s18   ;;  %s11304_s17 = sphi %s11346_s17, %s13142_s17   ;;  %s11300_s16 = sphi %s11344_s16, %s13141_s16   ;;  %s11296_s15 = sphi %s11342_s15, %s13140_s15  }
   0x6   : > { %s66_s21 = ssub.s32 %s11308_s18, %s11364_s20  ;;  %s69_s22 = sadd.s32 1, %s11304_s17 }
   0x7   : > { %p67_p0 = scmp.eq.s32.totalorder %s66_s21, 0  ;;  %p76_p1 = scmp.ne.s32.totalorder %s11304_s17, %s11300_s16 }
   0x8   : > { %p77_p2 = scmp.eq.s32.totalorder %s11308_s18, 0  ;;  %p82_p3 = scmp.ne.s32.totalorder %s11300_s16, %s11296_s15 }
   0x9   : > { %s11374_s23 = scalar_select %p67_p0, %s11304_s17, %s69_s22  }
   0xa   : > { %p78_p4 = por %p77_p2, %p76_p1  ;;  %p83_p5 = scmp.eq.s32.totalorder %s11361_s19, 0 }
   0xb   : > { %p11160_p6 = scmp.lt.s32.totalorder %s11308_s18, 2  ;;  %s11383_s25 = sand.u32 1, %s11304_s17  }
   0xc   : > { %p11378_p7 = por %p83_p5, %p82_p3  ;;  %s11144_s26 = smul.u32 48, %s11383_s25 }
   0xd   : > { %s11145_s27 = smul.u32 768, %s11308_s18  ;;  %p11387_p8 = pnand %p11160_p6, %p78_p4 }
   0xe   : > { %s13002_s24 = scalar_select %p11378_p7, 1, 0 }
   0xf   : > { %s11396_s5 = scalar_lea.hbm %s12916_s2, %s11145_s27  ;;  %s168_s6 = scalar_lea.vmem [#allocation2], %s11144_s26 }
  0x10   : > { %s175_s7 = sshll.u32 %s168_s6, 4  ;;  %s165_s8 = scalar_lea.sflag [#allocation3], %s11383_s25  ;;  %s11400_s7 = int_to_ptr.vmem [resolvable:$true] %s175_s7 }
  0x11   : > { %s11210_s9 = scalar_lea.hbm %s11396_s5, 768  ;;  %p11212_p11 = pneg %p11387_p8 }
  0x12   : > { %p11211_p10 = scmp.ne.s32.totalorder %s11396_s5, %s11210_s9  ;;  %s11215_s12 = scalar_lea.hbm %s12916_s2, 1536 }
  0x13   : > { %p11216_p0 = scmp.lt.u32.totalorder %s11396_s5, %s12916_s2  ;;  %p11217_p1 = scmp.lt.u32.totalorder %s11215_s12, %s11210_s9 }
  0x14   : > { %p11213_p12 = pnand %p11212_p11, %p11211_p10  ;;  %p11219_p3 = scmp.lt.u32.totalorder %s11210_s9, %s11396_s5 }
  0x15   : > { %p11218_p2 = por %p11217_p1, %p11216_p0 }
  0x16   : > { %p11214_p13 = pneg %p11213_p12 }
  0x17   : > { %p11220_p4 = por %p11219_p3, %p11218_p2 }
  0x19   : > { %p11221_p5 = pnand %p11220_p4, %p11214_p13 }
  0x1b   : > { %11224 = shalt.err (!%p11221_p5)
}
  0x1c   : > { %s11225_s15 = scalar_lea.vmem %s11400_s7, 768  ;;  %s11310_s21 = smov [#allocation2]  }
  0x1d   : > { %p11226_p6 = scmp.ne.s32.totalorder %s11400_s7, %s11225_s15  ;;  %s11230_s22 = sshll.u32 %s11310_s21, 4  ;;  %s11231_s22 = int_to_ptr.vmem [resolvable:$false] %s11230_s22 }
  0x1e   : > { %s11232_s29 = scalar_lea.vmem %s11231_s22, 1536  ;;  %p11233_p9 = scmp.lt.s32.totalorder %s11400_s7, %s11231_s22 }
  0x1f   : > { %p11228_p10 = pnand %p11226_p6, %p11212_p11  ;;  %p11234_p0 = scmp.lt.s32.totalorder %s11232_s29, %s11225_s15 }
  0x21   : > { %p11229_p12 = pneg %p11228_p10  ;;  %p11235_p1 = por %p11234_p0, %p11233_p9 }
  0x23   : > { %p11236_p2 = pnand %p11235_p1, %p11229_p12 }
  0x25   : > { %11239 = shalt.err (!%p11236_p2)
}
  0x26   : > { %s11311_s30 = smov 128   ;;  %s11312_s6 = smov 8  }
  0x27   : > { %11156 = dma.hbm_to_vmem [thread:$0]  (!%p11387_p8), %s11396_s5, 768, %s11400_s7, %s165_s8, %s11311_s30, %s11311_s30, %s11312_s6  }
  0x28   : > { %p204_p9 = scmp.lt.s32.totalorder %s11308_s18, 3  ;;  %s11440_s11 = scalar_lea.hbm %s12917_s3, %s11145_s27 }
  0x29   : > { %p13004_p13 = scmp.ge.s32.totalorder %s11308_s18, 1  ;;  %s189_s13 = scalar_lea.vmem [#allocation4], %s11144_s26 }
  0x2a   : > { %s196_s14 = sshll.u32 %s189_s13, 4  ;;  %s186_s5 = scalar_lea.sflag [#allocation5], %s11383_s25  ;;  %s11450_s14 = int_to_ptr.vmem [resolvable:$true] %s196_s14 }
  0x2b   : > { %p11444_p3 = pnand %p13004_p13, %p204_p9  ;;  %s11240_s7 = scalar_lea.hbm %s11440_s11, 768 }
  0x2c   : > { %p11241_p4 = scmp.ne.s32.totalorder %s11440_s11, %s11240_s7  ;;  %s11245_s8 = scalar_lea.hbm %s12917_s3, 1536 }
  0x2d   : > { %p11246_p10 = scmp.lt.u32.totalorder %s11440_s11, %s12917_s3  ;;  %p11247_p12 = scmp.lt.u32.totalorder %s11245_s8, %s11240_s7 }
  0x2e   : > { %p11243_p5 = pnand %p11241_p4, %p11212_p11  ;;  %p11249_p1 = scmp.lt.u32.totalorder %s11240_s7, %s11440_s11 }
  0x2f   : > { %p11248_p0 = por %p11247_p12, %p11246_p10 }
  0x30   : > { %p11244_p6 = pneg %p11243_p5 }
  0x31   : > { %p11250_p2 = por %p11249_p1, %p11248_p0 }
  0x33   : > { %p11251_p9 = pnand %p11250_p2, %p11244_p6 }
  0x35   : > { %11254 = shalt.err (!%p11251_p9)
}
  0x36   : > { %s11255_s26 = scalar_lea.vmem %s11450_s14, 768  ;;  %s11313_s22 = smov [#allocation4]  }
  0x37   : > { %p11256_p13 = scmp.ne.s32.totalorder %s11450_s14, %s11255_s26  ;;  %s11260_s29 = sshll.u32 %s11313_s22, 4  ;;  %s11261_s29 = int_to_ptr.vmem [resolvable:$false] %s11260_s29 }
  0x38   : > { %s11262_s9 = scalar_lea.vmem %s11261_s29, 1536  ;;  %p11263_p7 = scmp.lt.s32.totalorder %s11450_s14, %s11261_s29 }
  0x39   : > { %p11258_p4 = pnand %p11256_p13, %p11212_p11  ;;  %p11264_p10 = scmp.lt.s32.totalorder %s11262_s9, %s11255_s26 }
  0x3b   : > { %p11259_p5 = pneg %p11258_p4  ;;  %p11265_p12 = por %p11264_p10, %p11263_p7 }
  0x3d   : > { %p11266_p0 = pnand %p11265_p12, %p11259_p5 }
  0x3f   : > { %11269 = shalt.err (!%p11266_p0)
}
  0x40   : > { %11159 = dma.hbm_to_vmem [thread:$0]  (!%p11387_p8), %s11440_s11, 768, %s11450_s14, %s186_s5, %s11311_s30, %s11311_s30, %s11312_s6  }
  0x41   : > { %208 = sbr.rel (%p11444_p3) target bundleno = 1785 (0x6f9), region = 36 }
  0x48   : > { %s210_s10 = sand.u32 1, %s11300_s16   ;;  %p13006_p7 = scmp.ne.s32.totalorder %s13002_s24, 0 }
  0x49   : > { %s11148_s13 = smul.u32 48, %s210_s10  ;;  %s211_s7 = scalar_lea.sflag [#allocation3], %s210_s10 }
  0x4b   : > { %s214_s18 = scalar_lea.vmem [#allocation2], %s11148_s13 }
  0x4c   : > { %11287 = dma.done.wait (%p13006_p7), %s211_s7, 768  }
  0x4d   : > { %11289 = vsyncadd (%p13006_p7), %s211_s7, 4294966528  ;;  %s220_s28 = scalar_lea.sflag [#allocation5], %s210_s10  ;;  %s11488_s25 = scalar_lea.vmem [#allocation4], %s11148_s13 }
  0x4e   : > { %11291 = dma.done.wait (%p13006_p7), %s220_s28, 768  }
  0x4f   : > { %11293 = vsyncadd (%p13006_p7), %s220_s28, 4294966528  ;;  %vm287_vm0 = vcmask 130048   ;;  %v254_v0 = vld [vmem:[%s12914_s0] sm:$0xff]  ;;  %v255_v1 = vld [vmem:[%s12914_s0 + $0x8] sm:$0xff]  ;;  %vm11315_vm1 = vmmov 0   ;;  %vm9029_vm2 = vcmask 46080  }
  0x50   : > { %v11500_v2 = vld [vmem:[%s214_s18] sm:$0xff]  ;;  %v379_v3 = vand.u32 4294901760, %v254_v0  ;;  %v382_v4 = vand.u32 4294901760, %v255_v1  ;;  %v11504_v6 = vld [vmem:[%s214_s18 + $0x8] sm:$0xff]  ;;  %v11506_v7 = vld [vmem:[%s214_s18 + $0x10] sm:$0xff]  ;;  %vm9056_vm3 = vcmask 1041409  }
  0x51   : > { %v289_v5 = vsel %vm287_vm0, %v11500_v2, 0  ;;  %v11510_v8 = vmul.f32 %v11500_v2, %v11500_v2  ;;  %v292_v10 = vsel %vm287_vm0, %v11504_v6, 0  ;;  %v295_v11 = vsel %vm287_vm0, %v11506_v7, 0  ;;  %v11518_v12 = vld [vmem:[%s214_s18 + $0x18] sm:$0xff]  ;;  %v11520_v13 = vld [vmem:[%s214_s18 + $0x20] sm:$0xff]  ;;  %v11522_v14 = vld [vmem:[%s214_s18 + $0x28] sm:$0xff] }
  0x52   : > { %v11512_v9 = vand.u32 4294901760, %v289_v5  ;;  %v11524_v15 = vpack.c.bf16 %v382_v4, %v379_v3  ;;  %v11526_v16 = vand.u32 4294901760, %v292_v10  ;;  %v11528_v17 = vand.u32 4294901760, %v295_v11  ;;  %v11576_v39 = vld [vmem:[%s11488_s25] sm:$0xff]  ;;  %v11591_v44 = vld [vmem:[%s11488_s25 + $0x8] sm:$0xff]  ;;  %v11597_v49 = vld [vmem:[%s11488_s25 + $0x10] sm:$0xff] }
  0x53   : > { %v298_v18 = vsel %vm287_vm0, %v11518_v12, 0  ;;  %v11537_v21 = vsub.f32 %v254_v0, %v379_v3  ;;  %v11539_v22 = vsub.f32 %v255_v1, %v382_v4  ;;  %v301_v25 = vsel %vm287_vm0, %v11520_v13, 0  ;;  %v11600_v50 = vld [vmem:[%s11488_s25 + $0x18] sm:$0xff]  ;;  %v11605_v55 = vld [vmem:[%s11488_s25 + $0x20] sm:$0xff]  ;;  %v11608_v56 = vld [vmem:[%s11488_s25 + $0x28] sm:$0xff]  ;;  %p251_p8 = scmp.lt.s32.totalorder %s11361_s19, 1 }
  0x54   : > { %v11533_v19 = vsub.f32 %v289_v5, %v11512_v9  ;;  %v11535_v20 = vand.u32 4294901760, %v298_v18  ;;  %10551 = vmatprep.subr.bf16.mxu0 %v11524_v15  ;;  %v11543_v23 = vsub.f32 %v292_v10, %v11526_v16  ;;  %v11546_v24 = vsub.f32 %v295_v11, %v11528_v17 }
  0x55   : > { %v304_v26 = vsel %vm287_vm0, %v11522_v14, 0  ;;  %10553 = vmatpush3.bf16.msra.mxu0 %v11524_v15  ;;  %v12935_v29 = vand.u32 4294901760, %v11537_v21  ;;  %v12933_v30 = vand.u32 4294901760, %v11539_v22  ;;  %v11561_v33 = vand.u32 4294901760, %v301_v25  ;;  %s13145_s19 = smov (!%p251_p8, %s11361_s19), 1 }
  0x56   : > { %v12932_v27 = vand.u32 4294901760, %v11533_v19  ;;  %v11555_v28 = vsub.f32 %v298_v18, %v11535_v20  ;;  %v12930_v31 = vand.u32 4294901760, %v11543_v23  ;;  %v12929_v32 = vand.u32 4294901760, %v11546_v24  ;;  %s253_s8 = scalar_lea.vmem %s12918_s4, %s13145_s19 }
  0x57   : > { %v11563_v34 = vand.u32 4294901760, %v304_v26  ;;  %v749_v37 = vsub.f32 %v11537_v21, %v12935_v29  ;;  %v756_v38 = vsub.f32 %v11539_v22, %v12933_v30  ;;  %v11585_v42 = vsub.f32 %v301_v25, %v11561_v33 }
  0x58   : > { %v448_v35 = vsub.f32 %v11533_v19, %v12932_v27  ;;  %v12928_v36 = vand.u32 4294901760, %v11555_v28  ;;  %v458_v40 = vsub.f32 %v11543_v23, %v12930_v31  ;;  %v468_v41 = vsub.f32 %v11546_v24, %v12929_v32 }
  0x59   : > { %v11588_v43 = vsub.f32 %v304_v26, %v11563_v34  ;;  %v750_v47 = vand.u32 4294901760, %v749_v37  ;;  %v757_v48 = vand.u32 4294901760, %v756_v38  ;;  %v12925_v53 = vand.u32 4294901760, %v11585_v42 }
  0x5a   : > { %v449_v45 = vand.u32 4294901760, %v448_v35  ;;  %v478_v46 = vsub.f32 %v11555_v28, %v12928_v36  ;;  %v459_v51 = vand.u32 4294901760, %v458_v40  ;;  %v469_v52 = vand.u32 4294901760, %v468_v41 }
  0x5b   : > { %v12924_v54 = vand.u32 4294901760, %v11588_v43  ;;  %v10554_v58 = vpack.c.bf16 %v757_v48, %v750_v47  ;;  %v307_v59 = vsel %vm287_vm0, %v11576_v39, 0  ;;  %v310_v60 = vsel %vm287_vm0, %v11591_v44, 0 }
  0x5c   : > { %9630 = vmatprep.mubr.f32.mxu0 %v449_v45  ;;  %v479_v57 = vand.u32 4294901760, %v478_v46  ;;  %v488_v61 = vsub.f32 %v11585_v42, %v12925_v53  ;;  %v11620_v63 = vand.u32 4294901760, %v307_v59  ;;  %v11622_v0 = vand.u32 4294901760, %v310_v60 }
  0x5d   : > { %9631 = vmatmul.mubr.f32.vlgmr.msra.gmra.mrb[0].mxu0 %v459_v51  ;;  %v498_v62 = vsub.f32 %v11588_v43, %v12924_v54  ;;  %10555 = vmatprep.subr.bf16.mxu0 %v10554_v58  ;;  %v313_v1 = vsel %vm287_vm0, %v11597_v49, 0  ;;  %v316_v3 = vsel %vm287_vm0, %v11600_v50, 0  ;;  %v319_v4 = vsel %vm287_vm0, %v11605_v55, 0 }
  0x5e   : > { %9633 = vmatprep.mubr.f32.mxu0 %v469_v52  ;;  %v322_v5 = vsel %vm287_vm0, %v11608_v56, 0  ;;  %10557 = vmatpush3.bf16.msra.mxu0 %v10554_v58  ;;  %v489_v10 = vand.u32 4294901760, %v488_v61  ;;  %v11633_v18 = vsub.f32 %v307_v59, %v11620_v63  ;;  %v11636_v25 = vsub.f32 %v310_v60, %v11622_v0 }
  0x5f   : > { %v499_v11 = vand.u32 4294901760, %v498_v62  ;;  %v11638_v26 = vand.u32 4294901760, %v313_v1  ;;  %v11640_v35 = vand.u32 4294901760, %v316_v3  ;;  %v11642_v37 = vand.u32 4294901760, %v319_v4 }
  0x60   : > { %v11644_v38 = vand.u32 4294901760, %v322_v5  ;;  %v12921_v40 = vand.u32 4294901760, %v11633_v18  ;;  %v12920_v41 = vand.u32 4294901760, %v11636_v25  ;;  %v325_v45 = vsel %vm287_vm0, %v11510_v8, 0 }
  0x61   : > { %9634 = vmatmul.mubr.f32.gmra.mrb[2].mxu0 %v479_v57  ;;  %v270_v46 = vmul.f32 %v11504_v6, %v11504_v6  ;;  %v11653_v47 = vsub.f32 %v313_v1, %v11638_v26  ;;  %v11656_v48 = vsub.f32 %v316_v3, %v11640_v35  ;;  %v11659_v51 = vsub.f32 %v319_v4, %v11642_v37 }
  0x62   : > { %9636 = vmatprep.mubr.f32.mxu0 %v489_v10  ;;  %v11662_v52 = vsub.f32 %v322_v5, %v11644_v38  ;;  %v508_v8 = vsub.f32 %v11633_v18, %v12921_v40  ;;  %v518_v57 = vsub.f32 %v11636_v25, %v12920_v41  ;;  %v11670_v58 = vand.u32 4294901760, %v325_v45 }
  0x63   : > { %13007 = vst [vmem:[#allocation8_spill] sm:$0xff] %v11653_v47  ;;  %13008 = vst [vmem:[#allocation9_spill] sm:$0xff] %v11656_v48  ;;  %v328_v59 = vsel %vm287_vm0, %v270_v46, 0  ;;  %v12923_v60 = vand.u32 4294901760, %v11653_v47  ;;  %v12922_v61 = vand.u32 4294901760, %v11656_v48  ;;  %v12926_v62 = vand.u32 4294901760, %v11659_v51 }
  0x64   : > { %13009 = vst [vmem:[#allocation10_spill] sm:$0xff] %v11659_v51  ;;  %13010 = vst [vmem:[#allocation11_spill] sm:$0xff] %v11662_v52  ;;  %v12927_v1 = vand.u32 4294901760, %v11662_v52  ;;  %v509_v3 = vand.u32 4294901760, %v508_v8  ;;  %v519_v4 = vand.u32 4294901760, %v518_v57  ;;  %v11678_v5 = vsub.f32 %v325_v45, %v11670_v58 }
  0x65   : > { %9637 = vmatmul.mubr.f32.gmra.mrb[4].mxu0 %v499_v11  ;;  %v11680_v10 = vand.u32 4294901760, %v328_v59  ;;  %v528_v46 = vsub.f32 %v11653_v47, %v12923_v60  ;;  %v538_v41 = vsub.f32 %v11656_v48, %v12922_v61  ;;  %v548_v40 = vsub.f32 %v11659_v51, %v12926_v62 }
  0x66   : > { %13011 = vst [vmem:[#allocation12_spill] sm:$0xff] %v11678_v5  ;;  %v558_v11 = vsub.f32 %v11662_v52, %v12927_v1  ;;  %9639 = vmatprep.mubr.f32.mxu0 %v509_v3  ;;  %v12931_v45 = vand.u32 4294901760, %v11678_v5  ;;  %v271_v57 = vmul.f32 %v11506_v7, %v11506_v7  ;;  %v272_v61 = vmul.f32 %v11518_v12, %v11518_v12 }
  0x67   : > { %v11696_v8 = vsub.f32 %v328_v59, %v11680_v10  ;;  %v529_v60 = vand.u32 4294901760, %v528_v46  ;;  %v539_v54 = vand.u32 4294901760, %v538_v41  ;;  %v549_v53 = vand.u32 4294901760, %v548_v40 }
  0x68   : > { %v559_v62 = vand.u32 4294901760, %v558_v11  ;;  %v568_v3 = vsub.f32 %v11678_v5, %v12931_v45  ;;  %v331_v59 = vsel %vm287_vm0, %v271_v57, 0  ;;  %v334_v36 = vsel %vm287_vm0, %v272_v61, 0 }
  0x69   : > { %13012 = vst [vmem:[#allocation13_spill] sm:$0xff] %v11696_v8  ;;  %9640 = vmatmul.mubr.f32.gmra.mrb[6].mxu0 %v519_v4  ;;  %v12934_v1 = vand.u32 4294901760, %v11696_v8  ;;  %v11708_v32 = vand.u32 4294901760, %v331_v59  ;;  %v11710_v31 = vand.u32 4294901760, %v334_v36  ;;  %v273_v40 = vmul.f32 %v11520_v13, %v11520_v13 }
  0x6a   : > { %9642 = vmatprep.mubr.f32.mxu0 %v529_v60  ;;  %v274_v41 = vmul.f32 %v11522_v14, %v11522_v14  ;;  %v569_v4 = vand.u32 4294901760, %v568_v3  ;;  %v275_v11 = vmul.f32 %v11576_v39, %v11576_v39  ;;  %v276_v60 = vmul.f32 %v11591_v44, %v11591_v44 }
  0x6b   : > { %v578_v46 = vsub.f32 %v11696_v8, %v12934_v1  ;;  %v11724_v61 = vsub.f32 %v331_v59, %v11708_v32  ;;  %v11727_v57 = vsub.f32 %v334_v36, %v11710_v31  ;;  %v337_v45 = vsel %vm287_vm0, %v273_v40, 0 }
  0x6c   : > { %v340_v3 = vsel %vm287_vm0, %v274_v41, 0  ;;  %v11731_v30 = vand.u32 4294901760, %v337_v45  ;;  %v343_v29 = vsel %vm287_vm0, %v275_v11, 0  ;;  %v346_v36 = vsel %vm287_vm0, %v276_v60, 0 }
  0x6d   : > { %13013 = vst [vmem:[#allocation14_spill] sm:$0xff] %v11724_v61  ;;  %13014 = vst [vmem:[#allocation15_spill] sm:$0xff] %v11727_v57  ;;  %9643 = vmatmul.mubr.f32.gmra.mrb[8].mxu0 %v539_v54  ;;  %v579_v27 = vand.u32 4294901760, %v578_v46  ;;  %v11733_v1 = vand.u32 4294901760, %v340_v3  ;;  %v12944_v8 = vand.u32 4294901760, %v11724_v61  ;;  %v12947_v59 = vand.u32 4294901760, %v11727_v57 }
  0x6e   : > { %9645 = vmatprep.mubr.f32.mxu0 %v549_v53  ;;  %v11738_v5 = vand.u32 4294901760, %v343_v29  ;;  %v11742_v40 = vsub.f32 %v337_v45, %v11731_v30  ;;  %v11747_v41 = vand.u32 4294901760, %v346_v36  ;;  %v277_v46 = vmul.f32 %v11597_v49, %v11597_v49 }
  0x6f   : > { %v11745_v54 = vsub.f32 %v340_v3, %v11733_v1  ;;  %v588_v53 = vsub.f32 %v11724_v61, %v12944_v8  ;;  %v598_v11 = vsub.f32 %v11727_v57, %v12947_v59  ;;  %v278_v45 = vmul.f32 %v11600_v50, %v11600_v50 }
  0x70   : > { %13015 = vst [vmem:[#allocation16_spill] sm:$0xff] %v11742_v40  ;;  %v11758_v60 = vsub.f32 %v343_v29, %v11738_v5  ;;  %v12952_v3 = vand.u32 4294901760, %v11742_v40  ;;  %v11765_v51 = vsub.f32 %v346_v36, %v11747_v41  ;;  %v349_v8 = vsel %vm287_vm0, %v277_v46, 0 }
  0x71   : > { %13016 = vst [vmem:[#allocation17_spill] sm:$0xff] %v11745_v54  ;;  %9646 = vmatmul.mubr.f32.gmra.mrb[10].mxu0 %v559_v62  ;;  %v12953_v52 = vand.u32 4294901760, %v11745_v54  ;;  %v589_v61 = vand.u32 4294901760, %v588_v53  ;;  %v11769_v57 = vand.u32 4294901760, %v349_v8  ;;  %v281_v29 = vmul.f32 %v11576_v39, %v11500_v2 }
  0x72   : > { %13017 = vst [vmem:[#allocation18_spill] sm:$0xff] %v11758_v60  ;;  %9648 = vmatprep.mubr.f32.mxu0 %v569_v4  ;;  %v12960_v59 = vand.u32 4294901760, %v11758_v60  ;;  %v608_v62 = vsub.f32 %v11742_v40, %v12952_v3  ;;  %v352_v48 = vsel %vm287_vm0, %v278_v45, 0  ;;  %v279_v2 = vmul.f32 %v11605_v55, %v11605_v55 }
  0x73   : > { %v618_v36 = vsub.f32 %v11745_v54, %v12953_v52  ;;  %v11782_v46 = vsub.f32 %v349_v8, %v11769_v57  ;;  %v11784_v53 = vand.u32 4294901760, %v352_v48  ;;  %v599_v39 = vand.u32 4294901760, %v598_v11 }
  0x74   : > { %v628_v3 = vsub.f32 %v11758_v60, %v12960_v59  ;;  %v280_v52 = vmul.f32 %v11608_v56, %v11608_v56  ;;  %v609_v45 = vand.u32 4294901760, %v608_v62  ;;  %v355_v54 = vsel %vm287_vm0, %v279_v2, 0 }
  0x75   : > { %9649 = vmatmul.mubr.f32.gmra.mrb[12].mxu0 %v579_v27  ;;  %v11795_v8 = vsub.f32 %v352_v48, %v11784_v53  ;;  %v619_v40 = vand.u32 4294901760, %v618_v36  ;;  %v11798_v47 = vand.u32 4294901760, %v355_v54  ;;  %v361_v11 = vsel %vm287_vm0, %v281_v29, 0 }
  0x76   : > { %9651 = vmatprep.mubr.f32.mxu0 %v589_v61  ;;  %v358_v27 = vsel %vm287_vm0, %v280_v52, 0  ;;  %v13019_v59 = vand.u32 4294901760, %v11765_v51  ;;  %v11808_v4 = vand.u32 4294901760, %v361_v11  ;;  %v282_v36 = vmul.f32 %v11591_v44, %v11504_v6 }
  0x77   : > { %13018 = vst [vmem:[#allocation19_spill] sm:$0xff] %v11795_v8  ;;  %v11806_v62 = vand.u32 4294901760, %v358_v27  ;;  %v11811_v48 = vsub.f32 %v355_v54, %v11798_v47  ;;  %v283_v52 = vmul.f32 %v11597_v49, %v11506_v7  ;;  %v284_v29 = vmul.f32 %v11600_v50, %v11518_v12 }
  0x78   : > { %v638_v60 = vsub.f32 %v11765_v51, %v13019_v59  ;;  %v629_v59 = vand.u32 4294901760, %v628_v3  ;;  %v13020_v2 = vand.u32 4294901760, %v11782_v46  ;;  %v11826_v54 = vsub.f32 %v361_v11, %v11808_v4 }
  0x79   : > { %9652 = vmatmul.mubr.f32.gmra.mrb[14].mxu0 %v599_v39  ;;  %v11823_v39 = vsub.f32 %v358_v27, %v11806_v62  ;;  %v364_v44 = vsel %vm287_vm0, %v282_v36, 0  ;;  %v367_v7 = vsel %vm287_vm0, %v283_v52, 0  ;;  %v370_v12 = vsel %vm287_vm0, %v284_v29, 0 }
  0x7a   : > { %9654 = vmatprep.mubr.f32.mxu0 %v609_v45  ;;  %v648_v61 = vsub.f32 %v11782_v46, %v13020_v2  ;;  %13021 = vst [vmem:[#allocation20_spill] sm:$0xff] %v11826_v54  ;;  %v13022_v49 = vand.u32 4294901760, %v11795_v8  ;;  %v11837_v27 = vand.u32 4294901760, %v364_v44  ;;  %v639_v11 = vand.u32 4294901760, %v638_v60 }
  0x7b   : > { %v11839_v2 = vand.u32 4294901760, %v367_v7  ;;  %v11841_v6 = vand.u32 4294901760, %v370_v12  ;;  %v285_v36 = vmul.f32 %v11605_v55, %v11520_v13  ;;  %v13025_v29 = vand.u32 4294901760, %v11811_v48 }
  0x7c   : > { %v658_v50 = vsub.f32 %v11795_v8, %v13022_v49  ;;  %v649_v52 = vand.u32 4294901760, %v648_v61  ;;  %v11849_v3 = vsub.f32 %v364_v44, %v11837_v27  ;;  %v13027_v13 = vand.u32 4294901760, %v11823_v39 }
  0x7d   : > { %9655 = vmatmul.mubr.f32.gmra.mrb[16].mxu0 %v619_v40  ;;  %13023 = vst [vmem:[#allocation21_spill] sm:$0xff] %v11839_v2  ;;  %13024 = vst [vmem:[#allocation22_spill] sm:$0xff] %v11841_v6  ;;  %v668_v49 = vsub.f32 %v11811_v48, %v13025_v29  ;;  %v286_v40 = vmul.f32 %v11608_v56, %v11522_v14  ;;  %v11854_v60 = vsub.f32 %v367_v7, %v11839_v2  ;;  %vm9058_vm4 = vcmask 1042434  }
  0x7e   : > { %9657 = vmatprep.mubr.f32.mxu0 %v629_v59  ;;  %13026 = vst [vmem:[#allocation23_spill] sm:$0xff] %v11849_v3  ;;  %v373_v45 = vsel %vm287_vm0, %v285_v36, 0  ;;  %v659_v8 = vand.u32 4294901760, %v658_v50  ;;  %v678_v55 = vsub.f32 %v11823_v39, %v13027_v13  ;;  %v13028_v61 = vand.u32 4294901760, %v11826_v54 }
  0x7f   : > { %v11863_v29 = vand.u32 4294901760, %v373_v45  ;;  %v12967_v44 = vand.u32 4294901760, %v11849_v3  ;;  %v11867_v14 = vsub.f32 %v370_v12, %v11841_v6  ;;  %v376_v56 = vsel %vm287_vm0, %v286_v40, 0 }
  0x80   : > { %v688_v59 = vsub.f32 %v11826_v54, %v13028_v61  ;;  %v10558_v7 = vpack.c.bf16 %v11539_v22, %v11537_v21  ;;  %v669_v50 = vand.u32 4294901760, %v668_v49  ;;  %v12973_v36 = vand.u32 4294901760, %v11854_v60 }
  0x81   : > { %13029 = vst [vmem:[#allocation24_spill] sm:$0xff] %v11863_v29  ;;  %9658 = vmatmul.mubr.f32.gmra.mrb[18].mxu0 %v639_v11  ;;  %v11874_v13 = vsub.f32 %v373_v45, %v11863_v29  ;;  %v11876_v61 = vand.u32 4294901760, %v376_v56  ;;  %v679_v11 = vand.u32 4294901760, %v678_v55  ;;  %v698_v12 = vsub.f32 %v11849_v3, %v12967_v44 }
  0x82   : > { %9660 = vmatprep.mubr.f32.mxu0 %v649_v52  ;;  %10559 = vmatprep.subr.bf16.mxu0 %v10558_v7  ;;  %v12970_v40 = vand.u32 4294901760, %v11867_v14  ;;  %v689_v52 = vand.u32 4294901760, %v688_v59  ;;  %v708_v45 = vsub.f32 %v11854_v60, %v12973_v36  ;;  %v13048_v36 = vand.u32 4294901760, %v11543_v23 }
  0x83   : > { %13030 = vst [vmem:[#allocation25_spill] sm:$0xff] %v11876_v61  ;;  %v11883_v54 = vsub.f32 %v376_v56, %v11876_v61  ;;  %v12972_v49 = vand.u32 4294901760, %v11874_v13  ;;  %vm9061_vm5 = vcmask 43008   ;;  %vm9072_vm6 = vcmask 16384  }
  0x84   : > { %v718_v55 = vsub.f32 %v11867_v14, %v12970_v40  ;;  %v709_v3 = vand.u32 4294901760, %v708_v45  ;;  %v13031_v40 = vand.u32 4294901760, %v11537_v21  ;;  %v13033_v21 = vld [vmem:[#allocation8_spill] sm:$0xff] }
  0x85   : > { %9661 = vmatmul.mubr.f32.gmra.mrb[20].mxu0 %v659_v8  ;;  %v699_v8 = vand.u32 4294901760, %v698_v12  ;;  %v12971_v44 = vand.u32 4294901760, %v11883_v54  ;;  %v728_v59 = vsub.f32 %v11874_v13, %v12972_v49  ;;  %v13047_v49 = vand.u32 4294901760, %v11533_v19 }
  0x86   : > { %9663 = vmatprep.mubr.f32.mxu0 %v669_v50  ;;  %v719_v56 = vand.u32 4294901760, %v718_v55  ;;  %v13039_v55 = vld [vmem:[#allocation14_spill] sm:$0xff] }
  0x87   : > { %v738_v50 = vsub.f32 %v11883_v54, %v12971_v44  ;;  %v13046_v44 = vld [vmem:[#allocation23_spill] sm:$0xff] }
  0x89   : > { %9664 = vmatmul.mubr.f32.gmra.mrb[22].mxu0 %v679_v11  ;;  %v729_v11 = vand.u32 4294901760, %v728_v59  ;;  %v739_v12 = vand.u32 4294901760, %v738_v50  ;;  %v13040_v59 = vld [vmem:[#allocation15_spill] sm:$0xff]  ;;  %v13042_v50 = vld [vmem:[#allocation17_spill] sm:$0xff] }
  0x8a   : > { %9666 = vmatprep.mubr.f32.mxu0 %v689_v52  ;;  %v13032_v52 = vand.u32 4294901760, %v11539_v22  ;;  %v13034_v22 = vld [vmem:[#allocation9_spill] sm:$0xff] }
  0x8c   : > { %v11903_v45 = vpack.c.bf16 %v13032_v52, %v13031_v40  ;;  %v13037_v40 = vld [vmem:[#allocation12_spill] sm:$0xff] }
  0x8d   : > { %9667 = vmatmul.mubr.f32.gmra.mrb[24].mxu0 %v699_v8  ;;  %v13038_v8 = vld [vmem:[#allocation13_spill] sm:$0xff]  ;;  %v13045_v52 = vld [vmem:[#allocation20_spill] sm:$0xff] }
  0x8e   : > { %9669 = vmatprep.mubr.f32.mxu0 %v709_v3  ;;  %v13035_v3 = vld [vmem:[#allocation10_spill] sm:$0xff] }
  0x91   : > { %9670 = vmatmul.mubr.f32.gmra.mrb[26].mxu0 %v719_v56  ;;  %v13041_v56 = vld [vmem:[#allocation16_spill] sm:$0xff] }
  0x92   : > { %9672 = vmatprep.mubr.f32.mxu0 %v729_v11  ;;  %v13043_v11 = vld [vmem:[#allocation18_spill] sm:$0xff] }
  0x95   : > { %9673 = vmatmul.mubr.f32.gmra.mrb[28].mxu0 %v739_v12  ;;  %v13044_v12 = vld [vmem:[#allocation19_spill] sm:$0xff] }
  0x96   : > { %9679 = vmatprep.mubr.f32.mxu0 %v11512_v9 }
  0x99   : > { %9680 = vmatmul.mubr.f32.vlgmr.msra.gmra.mrb[0].mxu0 %v11526_v16 }
  0x9a   : > { %9682 = vmatprep.mubr.f32.mxu0 %v11528_v17  ;;  %10561 = vmatpush3.bf16.msra.mxu0 %v10558_v7  ;;  %v13036_v7 = vld [vmem:[#allocation11_spill] sm:$0xff] }
  0x9b   : > { %10563 = vmatprep.subr.bf16.mxu0 %v11524_v15 }
  0x9d   : > { %9683 = vmatmul.mubr.f32.gmra.mrb[2].mxu0 %v11535_v20 }
  0x9e   : > { %9685 = vmatprep.mubr.f32.mxu0 %v11561_v33 }
  0xa1   : > { %9686 = vmatmul.mubr.f32.gmra.mrb[4].mxu0 %v11563_v34 }
  0xa2   : > { %9688 = vmatprep.mubr.f32.mxu0 %v11620_v63 }
  0xa5   : > { %9689 = vmatmul.mubr.f32.gmra.mrb[6].mxu0 %v11622_v0 }
  0xa6   : > { %9691 = vmatprep.mubr.f32.mxu0 %v11638_v26 }
  0xa9   : > { %9692 = vmatmul.mubr.f32.gmra.mrb[8].mxu0 %v11640_v35 }
  0xaa   : > { %9694 = vmatprep.mubr.f32.mxu0 %v11642_v37 }
  0xad   : > { %9695 = vmatmul.mubr.f32.gmra.mrb[10].mxu0 %v11644_v38 }
  0xae   : > { %9697 = vmatprep.mubr.f32.mxu0 %v11670_v58 }
  0xb1   : > { %9698 = vmatmul.mubr.f32.gmra.mrb[12].mxu0 %v11680_v10 }
  0xb2   : > { %9700 = vmatprep.mubr.f32.mxu0 %v11708_v32 }
  0xb5   : > { %9701 = vmatmul.mubr.f32.gmra.mrb[14].mxu0 %v11710_v31 }
  0xb6   : > { %9703 = vmatprep.mubr.f32.mxu0 %v11731_v30 }
  0xb9   : > { %9704 = vmatmul.mubr.f32.gmra.mrb[16].mxu0 %v11733_v1 }
  0xba   : > { %9706 = vmatprep.mubr.f32.mxu0 %v11738_v5 }
  0xbd   : > { %9707 = vmatmul.mubr.f32.gmra.mrb[18].mxu0 %v11747_v41 }
  0xbe   : > { %9709 = vmatprep.mubr.f32.mxu0 %v11769_v57 }
  0xc1   : > { %9710 = vmatmul.mubr.f32.gmra.mrb[20].mxu0 %v11784_v53 }
  0xc2   : > { %9712 = vmatprep.mubr.f32.mxu0 %v11798_v47 }
  0xc5   : > { %9713 = vmatmul.mubr.f32.gmra.mrb[22].mxu0 %v11806_v62 }
  0xc6   : > { %9715 = vmatprep.mubr.f32.mxu0 %v11808_v4 }
  0xc9   : > { %9716 = vmatmul.mubr.f32.gmra.mrb[24].mxu0 %v11837_v27 }
  0xca   : > { %9718 = vmatprep.mubr.f32.mxu0 %v11839_v2  ;;  %v13052_v2 = vand.u32 4294901760, %v11588_v43 }
  0xcd   : > { %9719 = vmatmul.mubr.f32.gmra.mrb[26].mxu0 %v11841_v6  ;;  %v13051_v6 = vand.u32 4294901760, %v11585_v42 }
  0xce   : > { %9721 = vmatprep.mubr.f32.mxu0 %v11863_v29  ;;  %v13050_v29 = vand.u32 4294901760, %v11555_v28 }
  0xd1   : > { %9722 = vmatmul.mubr.f32.gmra.mrb[28].mxu0 %v11876_v61  ;;  %v13049_v61 = vand.u32 4294901760, %v11546_v24 }
  0xd2   : > { %9728 = vmatprep.mubr.f32.mxu0 %v11533_v19  ;;  %v13053_v19 = vand.u32 4294901760, %v11633_v18 }
  0xd5   : > { %9729 = vmatmul.mubr.f32.vlgmr.msra.gmra.mrb[0].mxu0 %v11543_v23  ;;  %v13054_v23 = vand.u32 4294901760, %v11636_v25 }
  0xd6   : > { %9731 = vmatprep.mubr.f32.mxu0 %v11546_v24  ;;  %10565 = vmatpush3.bf16.msra.mxu0 %v11524_v15  ;;  %v13055_v24 = vand.u32 4294901760, %v13033_v21 }
  0xd7   : > { %10567 = vmatprep.subr.bf16.mxu0 %v11903_v45 }
  0xd9   : > { %9732 = vmatmul.mubr.f32.gmra.mrb[2].mxu0 %v11555_v28  ;;  %v13057_v28 = vand.u32 4294901760, %v13035_v3 }
  0xda   : > { %9734 = vmatprep.mubr.f32.mxu0 %v11585_v42  ;;  %v13058_v42 = vand.u32 4294901760, %v13036_v7 }
  0xdd   : > { %9735 = vmatmul.mubr.f32.gmra.mrb[4].mxu0 %v11588_v43  ;;  %v13059_v43 = vand.u32 4294901760, %v13037_v40 }
  0xde   : > { %9737 = vmatprep.mubr.f32.mxu0 %v11633_v18  ;;  %v13060_v18 = vand.u32 4294901760, %v13038_v8 }
  0xe1   : > { %9738 = vmatmul.mubr.f32.gmra.mrb[6].mxu0 %v11636_v25  ;;  %v13061_v25 = vand.u32 4294901760, %v13039_v55 }
  0xe2   : > { %9740 = vmatprep.mubr.f32.mxu0 %v13033_v21  ;;  %v13068_v21 = vand.u32 4294901760, %v13044_v12 }
  0xe5   : > { %9741 = vmatmul.mubr.f32.gmra.mrb[8].mxu0 %v13034_v22 }
  0xe6   : > { %9743 = vmatprep.mubr.f32.mxu0 %v13035_v3  ;;  %v13070_v3 = vand.u32 4294901760, %v11823_v39 }
  0xe9   : > { %9744 = vmatmul.mubr.f32.gmra.mrb[10].mxu0 %v13036_v7  ;;  %v13071_v7 = vand.u32 4294901760, %v13045_v52 }
  0xea   : > { %9746 = vmatprep.mubr.f32.mxu0 %v13037_v40  ;;  %v13072_v40 = vand.u32 4294901760, %v13046_v44 }
  0xed   : > { %9747 = vmatmul.mubr.f32.gmra.mrb[12].mxu0 %v13038_v8  ;;  %v13075_v8 = vand.u32 4294901760, %v11874_v13 }
  0xee   : > { %9749 = vmatprep.mubr.f32.mxu0 %v13039_v55 }
  0xf1   : > { %9750 = vmatmul.mubr.f32.gmra.mrb[14].mxu0 %v13040_v59 }
  0xf2   : > { %9752 = vmatprep.mubr.f32.mxu0 %v13041_v56 }
  0xf5   : > { %9753 = vmatmul.mubr.f32.gmra.mrb[16].mxu0 %v13042_v50 }
  0xf6   : > { %9755 = vmatprep.mubr.f32.mxu0 %v13043_v11 }
  0xf9   : > { %9756 = vmatmul.mubr.f32.gmra.mrb[18].mxu0 %v11765_v51 }
  0xfa   : > { %9758 = vmatprep.mubr.f32.mxu0 %v11782_v46 }
  0xfd   : > { %9759 = vmatmul.mubr.f32.gmra.mrb[20].mxu0 %v13044_v12 }
  0xfe   : > { %9761 = vmatprep.mubr.f32.mxu0 %v11811_v48 }
 0x101   : > { %9762 = vmatmul.mubr.f32.gmra.mrb[22].mxu0 %v11823_v39  ;;  %v13078_v39 = vld [vmem:[#allocation22_spill] sm:$0xff] }
 0x102   : > { %9764 = vmatprep.mubr.f32.mxu0 %v13045_v52 }
 0x105   : > { %9765 = vmatmul.mubr.f32.gmra.mrb[24].mxu0 %v13046_v44 }
 0x106   : > { %9767 = vmatprep.mubr.f32.mxu0 %v11854_v60 }
 0x109   : > { %9768 = vmatmul.mubr.f32.gmra.mrb[26].mxu0 %v11867_v14 }
 0x10a   : > { %9770 = vmatprep.mubr.f32.mxu0 %v11874_v13 }
 0x10d   : > { %9771 = vmatmul.mubr.f32.gmra.mrb[28].mxu0 %v11883_v54 }
 0x10e   : > { %9777 = vmatprep.mubr.f32.mxu0 %v13047_v49  ;;  %v13066_v49 = vand.u32 4294901760, %v11765_v51  ;;  %v13073_v51 = vand.u32 4294901760, %v11854_v60  ;;  %v13080_v60 = vld [vmem:[#allocation25_spill] sm:$0xff] }
 0x111   : > { %9778 = vmatmul.mubr.f32.vlgmr.msra.gmra.mrb[0].mxu0 %v13048_v36  ;;  %v13056_v36 = vand.u32 4294901760, %v13034_v22  ;;  %v13069_v22 = vand.u32 4294901760, %v11811_v48  ;;  %v13076_v48 = vand.u32 4294901760, %v11883_v54  ;;  %v13079_v54 = vld [vmem:[#allocation24_spill] sm:$0xff] }
 0x112   : > { %9780 = vmatprep.mubr.f32.mxu0 %v13049_v61  ;;  %10569 = vmatpush3.bf16.msra.mxu0 %v11903_v45  ;;  %v13065_v61 = vand.u32 4294901760, %v13043_v11  ;;  %v13067_v45 = vand.u32 4294901760, %v11782_v46  ;;  %v13074_v46 = vand.u32 4294901760, %v11867_v14 }
 0x113   : > { %10571 = vmatprep.subr.bf16.mxu0 %v11524_v15 }
 0x115   : > { %9781 = vmatmul.mubr.f32.gmra.mrb[2].mxu0 %v13050_v29  ;;  %v13064_v29 = vand.u32 4294901760, %v13042_v50 }
 0x116   : > { %9783 = vmatprep.mubr.f32.mxu0 %v13051_v6  ;;  %v13062_v6 = vand.u32 4294901760, %v13040_v59 }
 0x119   : > { %9784 = vmatmul.mubr.f32.gmra.mrb[4].mxu0 %v13052_v2  ;;  %v13063_v2 = vand.u32 4294901760, %v13041_v56 }
 0x11a   : > { %9786 = vmatprep.mubr.f32.mxu0 %v13053_v19 }
 0x11d   : > { %9787 = vmatmul.mubr.f32.gmra.mrb[6].mxu0 %v13054_v23 }
 0x11e   : > { %9789 = vmatprep.mubr.f32.mxu0 %v13055_v24 }
 0x121   : > { %9790 = vmatmul.mubr.f32.gmra.mrb[8].mxu0 %v13056_v36 }
 0x122   : > { %9792 = vmatprep.mubr.f32.mxu0 %v13057_v28 }
 0x125   : > { %9793 = vmatmul.mubr.f32.gmra.mrb[10].mxu0 %v13058_v42 }
 0x126   : > { %9795 = vmatprep.mubr.f32.mxu0 %v13059_v43 }
 0x129   : > { %9796 = vmatmul.mubr.f32.gmra.mrb[12].mxu0 %v13060_v18 }
 0x12a   : > { %9798 = vmatprep.mubr.f32.mxu0 %v13061_v25 }
 0x12d   : > { %9799 = vmatmul.mubr.f32.gmra.mrb[14].mxu0 %v13062_v6 }
 0x12e   : > { %9801 = vmatprep.mubr.f32.mxu0 %v13063_v2 }
 0x131   : > { %9802 = vmatmul.mubr.f32.gmra.mrb[16].mxu0 %v13064_v29 }
 0x132   : > { %9804 = vmatprep.mubr.f32.mxu0 %v13065_v61 }
 0x135   : > { %9805 = vmatmul.mubr.f32.gmra.mrb[18].mxu0 %v13066_v49 }
 0x136   : > { %9807 = vmatprep.mubr.f32.mxu0 %v13067_v45 }
 0x139   : > { %9808 = vmatmul.mubr.f32.gmra.mrb[20].mxu0 %v13068_v21 }
 0x13a   : > { %9810 = vmatprep.mubr.f32.mxu0 %v13069_v22 }
 0x13d   : > { %9811 = vmatmul.mubr.f32.gmra.mrb[22].mxu0 %v13070_v3 }
 0x13e   : > { %9813 = vmatprep.mubr.f32.mxu0 %v13071_v7 }
 0x141   : > { %9814 = vmatmul.mubr.f32.gmra.mrb[24].mxu0 %v13072_v40 }
 0x142   : > { %9816 = vmatprep.mubr.f32.mxu0 %v13073_v51 }
 0x145   : > { %9817 = vmatmul.mubr.f32.gmra.mrb[26].mxu0 %v13074_v46 }
 0x146   : > { %9819 = vmatprep.mubr.f32.mxu0 %v13075_v8 }
 0x149   : > { %9820 = vmatmul.mubr.f32.gmra.mrb[28].mxu0 %v13076_v48 }
 0x14a   : > { %9826 = vmatprep.mubr.f32.mxu0 %v11512_v9 }
 0x14d   : > { %9827 = vmatmul.mubr.f32.vlgmr.msra.gmra.mrb[0].mxu0 %v11526_v16 }
 0x14e   : > { %9829 = vmatprep.mubr.f32.mxu0 %v11528_v17  ;;  %10573 = vmatpush3.bf16.msra.mxu0 %v11524_v15  ;;  %v13077_v15 = vld [vmem:[#allocation21_spill] sm:$0xff] }
 0x151   : > { %9830 = vmatmul.mubr.f32.gmra.mrb[2].mxu0 %v11535_v20 }
 0x152   : > { %9832 = vmatprep.mubr.f32.mxu0 %v11561_v33 }
 0x155   : > { %9833 = vmatmul.mubr.f32.gmra.mrb[4].mxu0 %v11563_v34 }
 0x156   : > { %9835 = vmatprep.mubr.f32.mxu0 %v11620_v63 }
 0x159   : > { %9836 = vmatmul.mubr.f32.gmra.mrb[6].mxu0 %v11622_v0 }
 0x15a   : > { %9838 = vmatprep.mubr.f32.mxu0 %v11638_v26 }
 0x15d   : > { %9839 = vmatmul.mubr.f32.gmra.mrb[8].mxu0 %v11640_v35 }
 0x15e   : > { %9841 = vmatprep.mubr.f32.mxu0 %v11642_v37 }
 0x161   : > { %9842 = vmatmul.mubr.f32.gmra.mrb[10].mxu0 %v11644_v38 }
 0x162   : > { %9844 = vmatprep.mubr.f32.mxu0 %v11670_v58 }
 0x165   : > { %9845 = vmatmul.mubr.f32.gmra.mrb[12].mxu0 %v11680_v10 }
 0x166   : > { %9847 = vmatprep.mubr.f32.mxu0 %v11708_v32 }
 0x169   : > { %9848 = vmatmul.mubr.f32.gmra.mrb[14].mxu0 %v11710_v31 }
 0x16a   : > { %9850 = vmatprep.mubr.f32.mxu0 %v11731_v30 }
 0x16d   : > { %9851 = vmatmul.mubr.f32.gmra.mrb[16].mxu0 %v11733_v1 }
 0x16e   : > { %9853 = vmatprep.mubr.f32.mxu0 %v11738_v5 }
 0x171   : > { %9854 = vmatmul.mubr.f32.gmra.mrb[18].mxu0 %v11747_v41 }
 0x172   : > { %9856 = vmatprep.mubr.f32.mxu0 %v11769_v57 }
 0x175   : > { %9857 = vmatmul.mubr.f32.gmra.mrb[20].mxu0 %v11784_v53 }
 0x176   : > { %9859 = vmatprep.mubr.f32.mxu0 %v11798_v47 }
 0x179   : > { %9860 = vmatmul.mubr.f32.gmra.mrb[22].mxu0 %v11806_v62 }
 0x17a   : > { %9862 = vmatprep.mubr.f32.mxu0 %v11808_v4 }
 0x17d   : > { %9863 = vmatmul.mubr.f32.gmra.mrb[24].mxu0 %v11837_v27 }
 0x17e   : > { %9865 = vmatprep.mubr.f32.mxu0 %v13077_v15 }
 0x181   : > { %9866 = vmatmul.mubr.f32.gmra.mrb[26].mxu0 %v13078_v39 }
 0x182   : > { %9868 = vmatprep.mubr.f32.mxu0 %v13079_v54 }
 0x185   : > { %9869 = vmatmul.mubr.f32.gmra.mrb[28].mxu0 %v13080_v60 }
 0x186   : > { %9875 = vmatprep.mubr.f32.mxu0 %v11512_v9  ;;  %v12982_v9 = vmov 0.0|0.0  }
 0x187   : > { %10574 = vmatprep.subr.bf16.mxu1 %v12982_v9 }
 0x189   : > { %9876 = vmatmul.mubr.f32.vlgmr.msra.gmra.mrb[0].mxu0 %v11526_v16  ;;  %v12985_v16 = vmov 0.0  }
 0x18a   : > { %9878 = vmatprep.mubr.f32.mxu0 %v11528_v17  ;;  %9924 = vmatprep.mubr.msk.f32.mxu1 %vm11315_vm1, %v12985_v16  ;;  %v256_v17 = vld [vmem:[%s12915_s1] sm:$0x3f] }
 0x18d   : > { %9879 = vmatmul.mubr.f32.gmra.mrb[2].mxu0 %v11535_v20  ;;  %v2085_v20 = vsel %vm287_vm0, %v256_v17, 0 }
 0x18e   : > { %9881 = vmatprep.mubr.f32.mxu0 %v11561_v33 }
 0x191   : > { %9882 = vmatmul.mubr.f32.gmra.mrb[4].mxu0 %v11563_v34 }
 0x192   : > { %9884 = vmatprep.mubr.f32.mxu0 %v11620_v63 }
 0x195   : > { %9885 = vmatmul.mubr.f32.gmra.mrb[6].mxu0 %v11622_v0 }
 0x196   : > { %9887 = vmatprep.mubr.f32.mxu0 %v11638_v26 }
 0x199   : > { %9888 = vmatmul.mubr.f32.gmra.mrb[8].mxu0 %v11640_v35 }
 0x19a   : > { %9890 = vmatprep.mubr.f32.mxu0 %v11642_v37 }
 0x19d   : > { %9891 = vmatmul.mubr.f32.gmra.mrb[10].mxu0 %v11644_v38 }
 0x19e   : > { %9893 = vmatprep.mubr.f32.mxu0 %v11670_v58 }
 0x1a1   : > { %9894 = vmatmul.mubr.f32.gmra.mrb[12].mxu0 %v11680_v10 }
 0x1a2   : > { %9896 = vmatprep.mubr.f32.mxu0 %v11708_v32 }
 0x1a5   : > { %9897 = vmatmul.mubr.f32.gmra.mrb[14].mxu0 %v11710_v31 }
 0x1a6   : > { %9899 = vmatprep.mubr.f32.mxu0 %v11731_v30  ;;  %v12098_v30 = vand.u32 4294901760, %v2085_v20 }
 0x1a8   : > { %v12101_v31 = vsub.f32 %v2085_v20, %v12098_v30 }
 0x1a9   : > { %9900 = vmatmul.mubr.f32.gmra.mrb[16].mxu0 %v11733_v1 }
 0x1aa   : > { %9902 = vmatprep.mubr.f32.mxu0 %v11738_v5  ;;  %v12104_v32 = vand.u32 4294901760, %v12101_v31 }
 0x1ac   : > { %v2157_v0 = vsub.f32 %v12101_v31, %v12104_v32 }
 0x1ad   : > { %9903 = vmatmul.mubr.f32.gmra.mrb[18].mxu0 %v11747_v41 }
 0x1ae   : > { %9905 = vmatprep.mubr.f32.mxu0 %v11769_v57  ;;  %v12115_v10 = vand.u32 4294901760, %v2157_v0 }
 0x1b1   : > { %9906 = vmatmul.mubr.f32.gmra.mrb[20].mxu0 %v11784_v53 }
 0x1b2   : > { %9908 = vmatprep.mubr.f32.mxu0 %v11798_v47 }
 0x1b5   : > { %9909 = vmatmul.mubr.f32.gmra.mrb[22].mxu0 %v11806_v62 }
 0x1b6   : > { %9911 = vmatprep.mubr.f32.mxu0 %v11808_v4 }
 0x1b9   : > { %9912 = vmatmul.mubr.f32.gmra.mrb[24].mxu0 %v11837_v27 }
 0x1ba   : > { %9914 = vmatprep.mubr.f32.mxu0 %v13077_v15 }
 0x1bd   : > { %9915 = vmatmul.mubr.f32.gmra.mrb[26].mxu0 %v13078_v39 }
 0x1be   : > { %9917 = vmatprep.mubr.f32.mxu0 %v13079_v54 }
 0x1c1   : > { %9918 = vmatmul.mubr.f32.gmra.mrb[28].mxu0 %v13080_v60 }
 0x25c   : > { %v9877_v33 = vpop.f32.mrb[0].mxu0 }
 0x25d   : > { %v2091_v34 = vand.u32 4294901760, %v9877_v33  ;;  %v1906_v63 = vpop.f32.mrb[1].mxu0 }
 0x25e   : > { %v2088_v26 = vand.u32 4294901760, %v1906_v63 }
 0x25f   : > { %v12108_v35 = vsub.f32 %v9877_v33, %v2091_v34 }
 0x260   : > { %v12110_v37 = vpack.c.bf16 %v2091_v34, %v2088_v26  ;;  %v12112_v38 = vsub.f32 %v1906_v63, %v2088_v26  ;;  %v9880_v47 = vpop.f32.mrb[2].mxu0 }
 0x261   : > { %v2174_v58 = vand.u32 4294901760, %v12108_v35  ;;  %v2550_v1 = vand.u32 4294901760, %v9880_v47  ;;  %v1918_v5 = vpop.f32.mrb[3].mxu0 }
 0x262   : > { %v2167_v57 = vand.u32 4294901760, %v12112_v38  ;;  %v10581_v41 = vpack.c.bf16 %v12108_v35, %v12112_v38  ;;  %v2547_v4 = vand.u32 4294901760, %v1918_v5  ;;  %10576 = vmatpush3.bf16.msra.mxu1 %v12110_v37 }
 0x263   : > { %v2175_v53 = vsub.f32 %v12108_v35, %v2174_v58  ;;  %v12122_v62 = vsub.f32 %v9880_v47, %v2550_v1  ;;  %10577 = vmatprep.subr.bf16.mxu1 %v12982_v9 }
 0x264   : > { %v2168_v27 = vsub.f32 %v12112_v38, %v2167_v57  ;;  %v12126_v44 = vpack.c.bf16 %v2550_v1, %v2547_v4  ;;  %v12128_v14 = vsub.f32 %v1918_v5, %v2547_v4  ;;  %v9883_v13 = vpop.f32.mrb[4].mxu0  ;;  %v12130_v55 = vpack.c.bf16 %v2174_v58, %v2167_v57 }
 0x265   : > { %v2176_v59 = vand.u32 4294901760, %v2175_v53  ;;  %v2633_v56 = vand.u32 4294901760, %v12122_v62  ;;  %v3009_v50 = vand.u32 4294901760, %v9883_v13  ;;  %v1930_v11 = vpop.f32.mrb[5].mxu0  ;;  %9925 = vmatmul.mubr.f32.vlgmr.msra.gmra.mrb[0].mxu1 %v12115_v10 }
 0x266   : > { %v2169_v12 = vand.u32 4294901760, %v2168_v27  ;;  %v2626_v52 = vand.u32 4294901760, %v12128_v14  ;;  %v3006_v23 = vand.u32 4294901760, %v1930_v11  ;;  %9931 = vmatprep.mubr.msk.f32.mxu1 %vm11315_vm1, %v12985_v16 }
 0x267   : > { %v2634_v24 = vsub.f32 %v12122_v62, %v2633_v56  ;;  %v12140_v36 = vsub.f32 %v9883_v13, %v3009_v50 }
 0x268   : > { %v2627_v28 = vsub.f32 %v12128_v14, %v2626_v52  ;;  %v12143_v42 = vpack.c.bf16 %v3009_v50, %v3006_v23  ;;  %v12145_v43 = vsub.f32 %v1930_v11, %v3006_v23  ;;  %v9886_v18 = vpop.f32.mrb[6].mxu0  ;;  %v10578_v25 = vpack.c.bf16 %v2176_v59, %v2169_v12 }
 0x269   : > { %v2635_v6 = vand.u32 4294901760, %v2634_v24  ;;  %v3092_v2 = vand.u32 4294901760, %v12140_v36  ;;  %v3468_v29 = vand.u32 4294901760, %v9886_v18  ;;  %v1942_v61 = vpop.f32.mrb[7].mxu0  ;;  %v12148_v49 = vpack.c.bf16 %v2633_v56, %v2626_v52 }
 0x26a   : > { %v2628_v45 = vand.u32 4294901760, %v2627_v28  ;;  %v3085_v21 = vand.u32 4294901760, %v12145_v43  ;;  %v3465_v3 = vand.u32 4294901760, %v1942_v61  ;;  %10579 = vmatpush3.bf16.msra.mxu1 %v10578_v25 }
 0x26b   : > { %v3093_v7 = vsub.f32 %v12140_v36, %v3092_v2  ;;  %v12154_v40 = vsub.f32 %v9886_v18, %v3468_v29  ;;  %10580 = vmatprep.subr.bf16.mxu1 %v12982_v9 }
 0x26c   : > { %v3086_v51 = vsub.f32 %v12145_v43, %v3085_v21  ;;  %v12158_v46 = vpack.c.bf16 %v3468_v29, %v3465_v3  ;;  %v12160_v8 = vsub.f32 %v1942_v61, %v3465_v3  ;;  %v9889_v48 = vpop.f32.mrb[8].mxu0  ;;  %v12162_v15 = vpack.c.bf16 %v2635_v6, %v2628_v45 }
 0x26d   : > { %v3094_v39 = vand.u32 4294901760, %v3093_v7  ;;  %v3551_v54 = vand.u32 4294901760, %v12154_v40  ;;  %v3927_v60 = vand.u32 4294901760, %v9889_v48  ;;  %v1954_v17 = vpop.f32.mrb[9].mxu0  ;;  %9932 = vmatmul.mubr.f32.vlgmr.msra.gmra.mrb[0].mxu1 %v12098_v30  ;;  %v12166_v20 = vpack.c.bf16 %v3092_v2, %v3085_v21 }
 0x26e   : > { %v3087_v33 = vand.u32 4294901760, %v3086_v51  ;;  %v3544_v34 = vand.u32 4294901760, %v12160_v8  ;;  %v3924_v0 = vand.u32 4294901760, %v1954_v17  ;;  %10582 = vmatpush3.bf16.msra.mxu1 %v10581_v41  ;;  %9938 = vmatprep.mubr.msk.f32.mxu1 %vm11315_vm1, %v12985_v16 }
 0x26f   : > { %v3552_v26 = vsub.f32 %v12154_v40, %v3551_v54  ;;  %v12174_v35 = vsub.f32 %v9889_v48, %v3927_v60  ;;  %10583 = vmatprep.subr.bf16.mxu1 %v12982_v9 }
 0x270   : > { %v3545_v38 = vsub.f32 %v12160_v8, %v3544_v34  ;;  %v12178_v47 = vpack.c.bf16 %v3927_v60, %v3924_v0  ;;  %v12180_v58 = vsub.f32 %v1954_v17, %v3924_v0  ;;  %v9892_v1 = vpop.f32.mrb[10].mxu0  ;;  %v12182_v5 = vpack.c.bf16 %v3094_v39, %v3087_v33 }
 0x271   : > { %v3553_v57 = vand.u32 4294901760, %v3552_v26  ;;  %v4010_v41 = vand.u32 4294901760, %v12174_v35  ;;  %v4386_v4 = vand.u32 4294901760, %v9892_v1  ;;  %v1966_v53 = vpop.f32.mrb[11].mxu0  ;;  %v12185_v27 = vpack.c.bf16 %v3551_v54, %v3544_v34 }
 0x272   : > { %v3546_v13 = vand.u32 4294901760, %v3545_v38  ;;  %v4003_v59 = vand.u32 4294901760, %v12180_v58  ;;  %v4383_v50 = vand.u32 4294901760, %v1966_v53 }
 0x273   : > { %v4011_v11 = vsub.f32 %v12174_v35, %v4010_v41  ;;  %v12191_v12 = vsub.f32 %v9892_v1, %v4386_v4 }
 0x274   : > { %v4004_v52 = vsub.f32 %v12180_v58, %v4003_v59  ;;  %v12194_v23 = vpack.c.bf16 %v4386_v4, %v4383_v50  ;;  %v12196_v24 = vsub.f32 %v1966_v53, %v4383_v50  ;;  %v9895_v28 = vpop.f32.mrb[12].mxu0  ;;  %v12198_v18 = vpack.c.bf16 %v3553_v57, %v3546_v13 }
 0x275   : > { %v4012_v25 = vand.u32 4294901760, %v4011_v11  ;;  %v4469_v6 = vand.u32 4294901760, %v12191_v12  ;;  %v4845_v2 = vand.u32 4294901760, %v9895_v28  ;;  %v1978_v29 = vpop.f32.mrb[13].mxu0  ;;  %9939 = vmatmul.mubr.f32.vlgmr.msra.gmra.mrb[0].mxu1 %v12101_v31  ;;  %v12202_v61 = vpack.c.bf16 %v4010_v41, %v4003_v59 }
 0x276   : > { %v4005_v45 = vand.u32 4294901760, %v4004_v52  ;;  %v4462_v21 = vand.u32 4294901760, %v12196_v24  ;;  %v4842_v7 = vand.u32 4294901760, %v1978_v29  ;;  %10585 = vmatpush3.bf16.msra.mxu1 %v12110_v37  ;;  %9945 = vmatprep.mubr.msk.f32.mxu1 %vm11315_vm1, %v12985_v16 }
 0x277   : > { %v4470_v51 = vsub.f32 %v12191_v12, %v4469_v6  ;;  %v12211_v48 = vsub.f32 %v9895_v28, %v4845_v2  ;;  %10586 = vmatprep.subr.bf16.mxu1 %v12982_v9 }
 0x278   : > { %v4463_v39 = vsub.f32 %v12196_v24, %v4462_v21  ;;  %v12215_v54 = vpack.c.bf16 %v4845_v2, %v4842_v7  ;;  %v12217_v60 = vsub.f32 %v1978_v29, %v4842_v7  ;;  %v9898_v17 = vpop.f32.mrb[14].mxu0  ;;  %v12219_v33 = vpack.c.bf16 %v4012_v25, %v4005_v45 }
 0x279   : > { %v4471_v34 = vand.u32 4294901760, %v4470_v51  ;;  %v4928_v0 = vand.u32 4294901760, %v12211_v48  ;;  %v5304_v26 = vand.u32 4294901760, %v9898_v17  ;;  %v1990_v38 = vpop.f32.mrb[15].mxu0  ;;  %v12222_v1 = vpack.c.bf16 %v4469_v6, %v4462_v21 }
 0x27a   : > { %v4464_v57 = vand.u32 4294901760, %v4463_v39  ;;  %v4921_v41 = vand.u32 4294901760, %v12217_v60  ;;  %v5301_v53 = vand.u32 4294901760, %v1990_v38 }
 0x27b   : > { %v4929_v13 = vsub.f32 %v12211_v48, %v4928_v0  ;;  %v12228_v59 = vsub.f32 %v9898_v17, %v5304_v26 }
 0x27c   : > { %v4922_v50 = vsub.f32 %v12217_v60, %v4921_v41  ;;  %v12231_v11 = vpack.c.bf16 %v5304_v26, %v5301_v53  ;;  %v12233_v52 = vsub.f32 %v1990_v38, %v5301_v53  ;;  %v9901_v28 = vpop.f32.mrb[16].mxu0  ;;  %v12235_v25 = vpack.c.bf16 %v4471_v34, %v4464_v57 }
 0x27d   : > { %v4930_v6 = vand.u32 4294901760, %v4929_v13  ;;  %v5387_v2 = vand.u32 4294901760, %v12228_v59  ;;  %v5763_v29 = vand.u32 4294901760, %v9901_v28  ;;  %v2002_v45 = vpop.f32.mrb[17].mxu0  ;;  %9946 = vmatmul.mubr.f32.vlgmr.msra.gmra.mrb[0].mxu1 %v12104_v32  ;;  %v12239_v21 = vpack.c.bf16 %v4928_v0, %v4921_v41 }
 0x27e   : > { %v4923_v7 = vand.u32 4294901760, %v4922_v50  ;;  %v5380_v51 = vand.u32 4294901760, %v12233_v52  ;;  %v5760_v17 = vand.u32 4294901760, %v2002_v45  ;;  %10588 = vmatpush3.bf16.msra.mxu1 %v12130_v55  ;;  %9952 = vmatprep.mubr.msk.f32.mxu1 %vm11315_vm1, %v12985_v16 }
 0x27f   : > { %v5388_v34 = vsub.f32 %v12228_v59, %v5387_v2  ;;  %v12248_v26 = vsub.f32 %v9901_v28, %v5763_v29  ;;  %10589 = vmatprep.subr.bf16.mxu1 %v12982_v9 }
 0x280   : > { %v5381_v0 = vsub.f32 %v12233_v52, %v5380_v51  ;;  %v12252_v38 = vpack.c.bf16 %v5763_v29, %v5760_v17  ;;  %v12254_v57 = vsub.f32 %v2002_v45, %v5760_v17  ;;  %v9904_v41 = vpop.f32.mrb[18].mxu0  ;;  %v12256_v53 = vpack.c.bf16 %v4930_v6, %v4923_v7 }
 0x281   : > { %13081 = vst [vmem:[#allocation8_spill] sm:$0xff] %v12248_v26  ;;  %v5389_v13 = vand.u32 4294901760, %v5388_v34  ;;  %v5846_v55 = vand.u32 4294901760, %v12248_v26  ;;  %v6222_v50 = vand.u32 4294901760, %v9904_v41  ;;  %v2014_v39 = vpop.f32.mrb[19].mxu0  ;;  %v12259_v4 = vpack.c.bf16 %v5387_v2, %v5380_v51 }
 0x282   : > { %13082 = vst [vmem:[#allocation9_spill] sm:$0xff] %v12254_v57  ;;  %v5382_v28 = vand.u32 4294901760, %v5381_v0  ;;  %v5839_v3 = vand.u32 4294901760, %v12254_v57  ;;  %v6219_v29 = vand.u32 4294901760, %v2014_v39 }
 0x283   : > { %v5847_v45 = vsub.f32 %v12248_v26, %v5846_v55  ;;  %v12265_v17 = vsub.f32 %v9904_v41, %v6222_v50 }
 0x284   : > { %v5840_v6 = vsub.f32 %v12254_v57, %v5839_v3  ;;  %v12268_v7 = vpack.c.bf16 %v6222_v50, %v6219_v29  ;;  %v12270_v34 = vsub.f32 %v2014_v39, %v6219_v29  ;;  %v9907_v63 = vpop.f32.mrb[20].mxu0  ;;  %v12272_v2 = vpack.c.bf16 %v5389_v13, %v5382_v28 }
 0x285   : > { %13083 = vst [vmem:[#allocation10_spill] sm:$0xff] %v12265_v17  ;;  %v5848_v51 = vand.u32 4294901760, %v5847_v45  ;;  %v6305_v0 = vand.u32 4294901760, %v12265_v17  ;;  %v6681_v22 = vand.u32 4294901760, %v9907_v63  ;;  %v2026_v19 = vpop.f32.mrb[21].mxu0  ;;  %9953 = vmatmul.mubr.f32.vlgmr.msra.gmra.mrb[0].mxu1 %v12098_v30  ;;  %v12276_v56 = vpack.c.bf16 %v5846_v55, %v5839_v3 }
 0x286   : > { %13084 = vst [vmem:[#allocation11_spill] sm:$0xff] %v12268_v7  ;;  %13085 = vst [vmem:[#allocation12_spill] sm:$0xff] %v12270_v34  ;;  %v5841_v41 = vand.u32 4294901760, %v5840_v6  ;;  %v6298_v9 = vand.u32 4294901760, %v12270_v34  ;;  %v6678_v39 = vand.u32 4294901760, %v2026_v19  ;;  %10591 = vmatpush3.bf16.msra.mxu1 %v12110_v37  ;;  %9959 = vmatprep.mubr.msk.f32.mxu1 %vm11315_vm1, %v12985_v16  ;;  %v13088_v29 = vmov 0.0|0.0  }
 0x287   : > { %13086 = vst [vmem:[#allocation13_spill] sm:$0xff] %v12276_v56  ;;  %v6306_v13 = vsub.f32 %v12265_v17, %v6305_v0  ;;  %v12285_v28 = vsub.f32 %v9907_v63, %v6681_v22  ;;  %10592 = vmatprep.subr.bf16.mxu1 %v13088_v29 }
 0x288   : > { %v6299_v3 = vsub.f32 %v12270_v34, %v6298_v9  ;;  %v12289_v55 = vpack.c.bf16 %v6681_v22, %v6678_v39  ;;  %v12291_v45 = vsub.f32 %v2026_v19, %v6678_v39  ;;  %v9910_v6 = vpop.f32.mrb[22].mxu0  ;;  %v12293_v50 = vpack.c.bf16 %v5848_v51, %v5841_v41 }
 0x289   : > { %13087 = vst [vmem:[#allocation14_spill] sm:$0xff] %v12285_v28  ;;  %v6307_v7 = vand.u32 4294901760, %v6306_v13  ;;  %v6764_v37 = vand.u32 4294901760, %v12285_v28  ;;  %v7140_v56 = vand.u32 4294901760, %v9910_v6  ;;  %v2038_v16 = vpop.f32.mrb[23].mxu0  ;;  %v12296_v57 = vpack.c.bf16 %v6305_v0, %v6298_v9 }
 0x28a   : > { %13089 = vst [vmem:[#allocation15_spill] sm:$0xff] %v12289_v55  ;;  %13090 = vst [vmem:[#allocation16_spill] sm:$0xff] %v12291_v45  ;;  %v6300_v63 = vand.u32 4294901760, %v6299_v3  ;;  %v6757_v17 = vand.u32 4294901760, %v12291_v45  ;;  %v7137_v22 = vand.u32 4294901760, %v2038_v16 }
 0x28b   : > { %13091 = vst [vmem:[#allocation17_spill] sm:$0xff] %v12293_v50  ;;  %13092 = vst [vmem:[#allocation18_spill] sm:$0xff] %v12296_v57  ;;  %v6765_v19 = vsub.f32 %v12285_v28, %v6764_v37  ;;  %v12302_v39 = vsub.f32 %v9910_v6, %v7140_v56 }
 0x28c   : > { %v6758_v51 = vsub.f32 %v12291_v45, %v6757_v17  ;;  %v12305_v41 = vpack.c.bf16 %v7140_v56, %v7137_v22  ;;  %v12307_v13 = vsub.f32 %v2038_v16, %v7137_v22  ;;  %v9913_v55 = vpop.f32.mrb[24].mxu0  ;;  %v12309_v9 = vpack.c.bf16 %v6307_v7, %v6300_v63 }
 0x28d   : > { %13093 = vst [vmem:[#allocation19_spill] sm:$0xff] %v12302_v39  ;;  %v6766_v0 = vand.u32 4294901760, %v6765_v19  ;;  %v7223_v3 = vand.u32 4294901760, %v12302_v39  ;;  %v7599_v57 = vand.u32 4294901760, %v9913_v55  ;;  %v2050_v26 = vpop.f32.mrb[25].mxu0  ;;  %9960 = vmatmul.mubr.f32.vlgmr.msra.gmra.mrb[0].mxu1 %v12098_v30  ;;  %v12313_v34 = vpack.c.bf16 %v6764_v37, %v6757_v17 }
 0x28e   : > { %13094 = vst [vmem:[#allocation20_spill] sm:$0xff] %v12305_v41  ;;  %13095 = vst [vmem:[#allocation23_spill] sm:$0xff] %v12307_v13  ;;  %v6759_v6 = vand.u32 4294901760, %v6758_v51  ;;  %v7216_v28 = vand.u32 4294901760, %v12307_v13  ;;  %v7596_v16 = vand.u32 4294901760, %v2050_v26  ;;  %10594 = vmatpush3.bf16.msra.mxu1 %v12126_v44  ;;  %v13098_v7 = vmov 0.0  }
 0x28f   : > { %13096 = vst [vmem:[#allocation21_spill] sm:$0xff] %v12309_v9  ;;  %13097 = vst [vmem:[#allocation22_spill] sm:$0xff] %v12313_v34  ;;  %9966 = vmatprep.mubr.msk.f32.mxu1 %vm11315_vm1, %v13098_v7  ;;  %v7224_v63 = vsub.f32 %v12302_v39, %v7223_v3  ;;  %v12322_v22 = vsub.f32 %v9913_v55, %v7599_v57  ;;  %10595 = vmatprep.subr.bf16.mxu1 %v13088_v29 }
 0x290   : > { %v7217_v17 = vsub.f32 %v12307_v13, %v7216_v28  ;;  %v12326_v37 = vpack.c.bf16 %v7599_v57, %v7596_v16  ;;  %v12328_v19 = vsub.f32 %v2050_v26, %v7596_v16  ;;  %v9916_v51 = vpop.f32.mrb[26].mxu0  ;;  %v12330_v56 = vpack.c.bf16 %v6766_v0, %v6759_v6 }
 0x291   : > { %13099 = vst [vmem:[#allocation24_spill] sm:$0xff] %v12322_v22  ;;  %v7225_v41 = vand.u32 4294901760, %v7224_v63  ;;  %v7682_v34 = vand.u32 4294901760, %v12322_v22  ;;  %v8058_v45 = vand.u32 4294901760, %v9916_v51  ;;  %v2062_v9 = vpop.f32.mrb[27].mxu0  ;;  %9967 = vmatmul.mubr.f32.vlgmr.msra.gmra.mrb[2].mxu1 %v12115_v10  ;;  %v12334_v55 = vpack.c.bf16 %v7223_v3, %v7216_v28 }
 0x292   : > { %13100 = vst [vmem:[#allocation25_spill] sm:$0xff] %v12326_v37  ;;  %13101 = vst [vmem:[#allocation26_spill] sm:$0xff] %v12328_v19  ;;  %v7218_v39 = vand.u32 4294901760, %v7217_v17  ;;  %v7675_v50 = vand.u32 4294901760, %v12328_v19  ;;  %v8055_v26 = vand.u32 4294901760, %v2062_v9  ;;  %10597 = vmatpush3.bf16.msra.mxu1 %v12162_v15  ;;  %9973 = vmatprep.mubr.msk.f32.mxu1 %vm11315_vm1, %v13098_v7 }
 0x293   : > { %13102 = vst [vmem:[#allocation27_spill] sm:$0xff] %v12334_v55  ;;  %v7683_v0 = vsub.f32 %v12322_v22, %v7682_v34  ;;  %v12343_v6 = vsub.f32 %v9916_v51, %v8058_v45  ;;  %10598 = vmatprep.subr.bf16.mxu1 %v13088_v29 }
 0x294   : > { %v7676_v28 = vsub.f32 %v12328_v19, %v7675_v50  ;;  %v12347_v3 = vpack.c.bf16 %v8058_v45, %v8055_v26  ;;  %v12349_v16 = vsub.f32 %v2062_v9, %v8055_v26  ;;  %v9919_v63 = vpop.f32.mrb[28].mxu0  ;;  %v12351_v17 = vpack.c.bf16 %v7225_v41, %v7218_v39 }
 0x295   : > { %13103 = vst [vmem:[#allocation28_spill] sm:$0xff] %v12343_v6  ;;  %v7684_v57 = vand.u32 4294901760, %v7683_v0  ;;  %v8141_v15 = vand.u32 4294901760, %v12343_v6  ;;  %v8517_v37 = vand.u32 4294901760, %v9919_v63  ;;  %v2074_v55 = vpop.f32.mrb[29].mxu0  ;;  %v12354_v13 = vpack.c.bf16 %v7682_v34, %v7675_v50 }
 0x296   : > { %13104 = vst [vmem:[#allocation29_spill] sm:$0xff] %v12347_v3  ;;  %v7677_v51 = vand.u32 4294901760, %v7676_v28  ;;  %v8134_v22 = vand.u32 4294901760, %v12349_v16  ;;  %v8514_v45 = vand.u32 4294901760, %v2074_v55 }
 0x297   : > { %v8142_v9 = vsub.f32 %v12343_v6, %v8141_v15  ;;  %v12360_v26 = vsub.f32 %v9919_v63, %v8517_v37 }
 0x298   : > { %v8135_v39 = vsub.f32 %v12349_v16, %v8134_v22  ;;  %v12363_v41 = vpack.c.bf16 %v8517_v37, %v8514_v45  ;;  %v12365_v0 = vsub.f32 %v2074_v55, %v8514_v45  ;;  %v12367_v3 = vpack.c.bf16 %v7684_v57, %v7677_v51 }
 0x299   : > { %v8143_v34 = vand.u32 4294901760, %v8142_v9  ;;  %v8600_v50 = vand.u32 4294901760, %v12360_v26  ;;  %9974 = vmatmul.mubr.f32.vlgmr.msra.gmra.mrb[2].mxu1 %v12098_v30  ;;  %v12371_v28 = vpack.c.bf16 %v8141_v15, %v8134_v22  ;;  %v13105_v37 = vpack.c.bf16 %v12122_v62, %v12128_v14 }
 0x29a   : > { %v8136_v19 = vand.u32 4294901760, %v8135_v39  ;;  %v8593_v6 = vand.u32 4294901760, %v12365_v0  ;;  %v10833_v63 = vpack.c.bf16 %v12360_v26, %v12365_v0  ;;  %9980 = vmatprep.mubr.msk.f32.mxu1 %vm11315_vm1, %v13098_v7  ;;  %v13106_v62 = vpack.c.bf16 %v12140_v36, %v12145_v43 }
 0x29b   : > { %10600 = vmatpush3.bf16.msra.mxu1 %v13105_v37  ;;  %v8601_v55 = vsub.f32 %v12360_v26, %v8600_v50  ;;  %v13108_v14 = vpack.c.bf16 %v12174_v35, %v12180_v58  ;;  %v13109_v36 = vpack.c.bf16 %v12191_v12, %v12196_v24  ;;  %v13113_v58 = vld [vmem:[#allocation8_spill] sm:$0xff]  ;;  %v13116_v12 = vld [vmem:[#allocation13_spill] sm:$0xff] }
 0x29c   : > { %10601 = vmatprep.subr.bf16.mxu1 %v13088_v29  ;;  %v8594_v22 = vsub.f32 %v12365_v0, %v8593_v6  ;;  %v12384_v57 = vpack.c.bf16 %v8600_v50, %v8593_v6  ;;  %v12386_v15 = vpack.c.bf16 %v8143_v34, %v8136_v19 }
 0x29d   : > { %v8602_v51 = vand.u32 4294901760, %v8601_v55  ;;  %v13123_v55 = vld [vmem:[#allocation15_spill] sm:$0xff] }
 0x29e   : > { %v8595_v45 = vand.u32 4294901760, %v8594_v22 }
 0x2a0   : > { %v12388_v9 = vpack.c.bf16 %v8602_v51, %v8595_v45 }
 0x2a1   : > { %9981 = vmatmul.mubr.f32.vlgmr.msra.gmra.mrb[2].mxu1 %v12101_v31 }
 0x2a2   : > { %10603 = vmatpush3.bf16.msra.mxu1 %v12126_v44  ;;  %9987 = vmatprep.mubr.msk.f32.mxu1 %vm11315_vm1, %v13098_v7 }
 0x2a3   : > { %10604 = vmatprep.subr.bf16.mxu1 %v13088_v29 }
 0x2a9   : > { %9988 = vmatmul.mubr.f32.vlgmr.msra.gmra.mrb[2].mxu1 %v12104_v32 }
 0x2aa   : > { %10606 = vmatpush3.bf16.msra.mxu1 %v12148_v49  ;;  %9994 = vmatprep.mubr.msk.f32.mxu1 %vm11315_vm1, %v13098_v7  ;;  %v13110_v49 = vpack.c.bf16 %v12211_v48, %v12217_v60 }
 0x2ab   : > { %10607 = vmatprep.subr.bf16.mxu1 %v13088_v29 }
 0x2b1   : > { %9995 = vmatmul.mubr.f32.vlgmr.msra.gmra.mrb[2].mxu1 %v12098_v30 }
 0x2b2   : > { %10609 = vmatpush3.bf16.msra.mxu1 %v12126_v44  ;;  %10001 = vmatprep.mubr.msk.f32.mxu1 %vm11315_vm1, %v13098_v7  ;;  %v13107_v44 = vpack.c.bf16 %v12154_v40, %v12160_v8  ;;  %v13111_v8 = vpack.c.bf16 %v12228_v59, %v12233_v52 }
 0x2b3   : > { %10610 = vmatprep.subr.bf16.mxu1 %v13088_v29 }
 0x2b9   : > { %10002 = vmatmul.mubr.f32.vlgmr.msra.gmra.mrb[2].mxu1 %v12098_v30 }
 0x2ba   : > { %10612 = vmatpush3.bf16.msra.mxu1 %v12143_v42  ;;  %10008 = vmatprep.mubr.msk.f32.mxu1 %vm11315_vm1, %v13098_v7 }
 0x2bb   : > { %10613 = vmatprep.subr.bf16.mxu1 %v13088_v29 }
 0x2bd   : > { %10009 = vmatmul.mubr.f32.vlgmr.msra.gmra.mrb[4].mxu1 %v12115_v10 }
 0x2be   : > { %10615 = vmatpush3.bf16.msra.mxu1 %v12182_v5  ;;  %10015 = vmatprep.mubr.msk.f32.mxu1 %vm11315_vm1, %v13098_v7  ;;  %v13114_v5 = vld [vmem:[#allocation9_spill] sm:$0xff] }
 0x2bf   : > { %10616 = vmatprep.subr.bf16.mxu1 %v13088_v29 }
 0x2c5   : > { %10016 = vmatmul.mubr.f32.vlgmr.msra.gmra.mrb[4].mxu1 %v12098_v30 }
 0x2c6   : > { %10618 = vmatpush3.bf16.msra.mxu1 %v13106_v62  ;;  %10022 = vmatprep.mubr.msk.f32.mxu1 %vm11315_vm1, %v13098_v7 }
 0x2c7   : > { %10619 = vmatprep.subr.bf16.mxu1 %v13088_v29 }
 0x2cd   : > { %10023 = vmatmul.mubr.f32.vlgmr.msra.gmra.mrb[4].mxu1 %v12101_v31 }
 0x2ce   : > { %10621 = vmatpush3.bf16.msra.mxu1 %v12143_v42  ;;  %10029 = vmatprep.mubr.msk.f32.mxu1 %vm11315_vm1, %v13098_v7 }
 0x2cf   : > { %10622 = vmatprep.subr.bf16.mxu1 %v13088_v29 }
 0x2d5   : > { %10030 = vmatmul.mubr.f32.vlgmr.msra.gmra.mrb[4].mxu1 %v12104_v32 }
 0x2d6   : > { %10624 = vmatpush3.bf16.msra.mxu1 %v12166_v20  ;;  %10036 = vmatprep.mubr.msk.f32.mxu1 %vm11315_vm1, %v13098_v7 }
 0x2d7   : > { %10625 = vmatprep.subr.bf16.mxu1 %v13088_v29 }
 0x2dd   : > { %10037 = vmatmul.mubr.f32.vlgmr.msra.gmra.mrb[4].mxu1 %v12098_v30 }
 0x2de   : > { %10627 = vmatpush3.bf16.msra.mxu1 %v12143_v42  ;;  %10043 = vmatprep.mubr.msk.f32.mxu1 %vm11315_vm1, %v13098_v7 }
 0x2df   : > { %10628 = vmatprep.subr.bf16.mxu1 %v13088_v29 }
 0x2e5   : > { %10044 = vmatmul.mubr.f32.vlgmr.msra.gmra.mrb[4].mxu1 %v12098_v30 }
 0x2e6   : > { %10630 = vmatpush3.bf16.msra.mxu1 %v12158_v46  ;;  %10050 = vmatprep.mubr.msk.f32.mxu1 %vm11315_vm1, %v13098_v7 }
 0x2e7   : > { %10631 = vmatprep.subr.bf16.mxu1 %v13088_v29 }
 0x2e9   : > { %10051 = vmatmul.mubr.f32.vlgmr.msra.gmra.mrb[6].mxu1 %v12115_v10 }
 0x2ea   : > { %10633 = vmatpush3.bf16.msra.mxu1 %v12198_v18  ;;  %10057 = vmatprep.mubr.msk.f32.mxu1 %vm11315_vm1, %v13098_v7 }
 0x2eb   : > { %10634 = vmatprep.subr.bf16.mxu1 %v13088_v29 }
 0x2f1   : > { %10058 = vmatmul.mubr.f32.vlgmr.msra.gmra.mrb[6].mxu1 %v12098_v30 }
 0x2f2   : > { %10636 = vmatpush3.bf16.msra.mxu1 %v13107_v44  ;;  %10064 = vmatprep.mubr.msk.f32.mxu1 %vm11315_vm1, %v13098_v7  ;;  %v13124_v44 = vld [vmem:[#allocation14_spill] sm:$0xff] }
 0x2f3   : > { %10637 = vmatprep.subr.bf16.mxu1 %v13088_v29 }
 0x2f9   : > { %10065 = vmatmul.mubr.f32.vlgmr.msra.gmra.mrb[6].mxu1 %v12101_v31 }
 0x2fa   : > { %10639 = vmatpush3.bf16.msra.mxu1 %v12158_v46  ;;  %10071 = vmatprep.mubr.msk.f32.mxu1 %vm11315_vm1, %v13098_v7 }
 0x2fb   : > { %10640 = vmatprep.subr.bf16.mxu1 %v13088_v29 }
 0x301   : > { %10072 = vmatmul.mubr.f32.vlgmr.msra.gmra.mrb[6].mxu1 %v12104_v32 }
 0x302   : > { %10642 = vmatpush3.bf16.msra.mxu1 %v12185_v27  ;;  %10078 = vmatprep.mubr.msk.f32.mxu1 %vm11315_vm1, %v13098_v7  ;;  %v13115_v27 = vpack.c.bf16 %v13113_v58, %v13114_v5 }
 0x303   : > { %10643 = vmatprep.subr.bf16.mxu1 %v13088_v29 }
 0x309   : > { %10079 = vmatmul.mubr.f32.vlgmr.msra.gmra.mrb[6].mxu1 %v12098_v30 }
 0x30a   : > { %10645 = vmatpush3.bf16.msra.mxu1 %v12158_v46  ;;  %10085 = vmatprep.mubr.msk.f32.mxu1 %vm11315_vm1, %v13098_v7 }
 0x30b   : > { %10646 = vmatprep.subr.bf16.mxu1 %v13088_v29 }
 0x311   : > { %10086 = vmatmul.mubr.f32.vlgmr.msra.gmra.mrb[6].mxu1 %v12098_v30 }
 0x312   : > { %10648 = vmatpush3.bf16.msra.mxu1 %v12178_v47  ;;  %10092 = vmatprep.mubr.msk.f32.mxu1 %vm11315_vm1, %v13098_v7 }
 0x313   : > { %10649 = vmatprep.subr.bf16.mxu1 %v13088_v29 }
 0x315   : > { %10093 = vmatmul.mubr.f32.vlgmr.msra.gmra.mrb[8].mxu1 %v12115_v10 }
 0x316   : > { %10651 = vmatpush3.bf16.msra.mxu1 %v12219_v33  ;;  %10099 = vmatprep.mubr.msk.f32.mxu1 %vm11315_vm1, %v13098_v7  ;;  %v13117_v33 = vld [vmem:[#allocation11_spill] sm:$0xff] }
 0x317   : > { %10652 = vmatprep.subr.bf16.mxu1 %v13088_v29 }
 0x31d   : > { %10100 = vmatmul.mubr.f32.vlgmr.msra.gmra.mrb[8].mxu1 %v12098_v30 }
 0x31e   : > { %10654 = vmatpush3.bf16.msra.mxu1 %v13108_v14  ;;  %10106 = vmatprep.mubr.msk.f32.mxu1 %vm11315_vm1, %v13098_v7  ;;  %v13125_v14 = vld [vmem:[#allocation16_spill] sm:$0xff] }
 0x31f   : > { %10655 = vmatprep.subr.bf16.mxu1 %v13088_v29 }
 0x325   : > { %10107 = vmatmul.mubr.f32.vlgmr.msra.gmra.mrb[8].mxu1 %v12101_v31 }
 0x326   : > { %10657 = vmatpush3.bf16.msra.mxu1 %v12178_v47  ;;  %10113 = vmatprep.mubr.msk.f32.mxu1 %vm11315_vm1, %v13098_v7 }
 0x327   : > { %10658 = vmatprep.subr.bf16.mxu1 %v13088_v29 }
 0x32d   : > { %10114 = vmatmul.mubr.f32.vlgmr.msra.gmra.mrb[8].mxu1 %v12104_v32 }
 0x32e   : > { %10660 = vmatpush3.bf16.msra.mxu1 %v12202_v61  ;;  %10120 = vmatprep.mubr.msk.f32.mxu1 %vm11315_vm1, %v13098_v7 }
 0x32f   : > { %10661 = vmatprep.subr.bf16.mxu1 %v13088_v29 }
 0x335   : > { %10121 = vmatmul.mubr.f32.vlgmr.msra.gmra.mrb[8].mxu1 %v12098_v30 }
 0x336   : > { %10663 = vmatpush3.bf16.msra.mxu1 %v12178_v47  ;;  %10127 = vmatprep.mubr.msk.f32.mxu1 %vm11315_vm1, %v13098_v7  ;;  %v13112_v47 = vld [vmem:[#allocation17_spill] sm:$0xff] }
 0x337   : > { %10664 = vmatprep.subr.bf16.mxu1 %v13088_v29 }
 0x33d   : > { %10128 = vmatmul.mubr.f32.vlgmr.msra.gmra.mrb[8].mxu1 %v12098_v30 }
 0x33e   : > { %10666 = vmatpush3.bf16.msra.mxu1 %v12194_v23  ;;  %10134 = vmatprep.mubr.msk.f32.mxu1 %vm11315_vm1, %v13098_v7 }
 0x33f   : > { %10667 = vmatprep.subr.bf16.mxu1 %v13088_v29 }
 0x341   : > { %10135 = vmatmul.mubr.f32.vlgmr.msra.gmra.mrb[10].mxu1 %v12115_v10 }
 0x342   : > { %10669 = vmatpush3.bf16.msra.mxu1 %v12235_v25  ;;  %10141 = vmatprep.mubr.msk.f32.mxu1 %vm11315_vm1, %v13098_v7  ;;  %v13119_v25 = vld [vmem:[#allocation10_spill] sm:$0xff] }
 0x343   : > { %10670 = vmatprep.subr.bf16.mxu1 %v13088_v29 }
 0x349   : > { %10142 = vmatmul.mubr.f32.vlgmr.msra.gmra.mrb[10].mxu1 %v12098_v30 }
 0x34a   : > { %10672 = vmatpush3.bf16.msra.mxu1 %v13109_v36  ;;  %10148 = vmatprep.mubr.msk.f32.mxu1 %vm11315_vm1, %v13098_v7  ;;  %v13126_v36 = vpack.c.bf16 %v13124_v44, %v13125_v14 }
 0x34b   : > { %10673 = vmatprep.subr.bf16.mxu1 %v13088_v29 }
 0x351   : > { %10149 = vmatmul.mubr.f32.vlgmr.msra.gmra.mrb[10].mxu1 %v12101_v31 }
 0x352   : > { %10675 = vmatpush3.bf16.msra.mxu1 %v12194_v23  ;;  %10155 = vmatprep.mubr.msk.f32.mxu1 %vm11315_vm1, %v13098_v7 }
 0x353   : > { %10676 = vmatprep.subr.bf16.mxu1 %v13088_v29 }
 0x359   : > { %10156 = vmatmul.mubr.f32.vlgmr.msra.gmra.mrb[10].mxu1 %v12104_v32 }
 0x35a   : > { %10678 = vmatpush3.bf16.msra.mxu1 %v12222_v1  ;;  %10162 = vmatprep.mubr.msk.f32.mxu1 %vm11315_vm1, %v13098_v7 }
 0x35b   : > { %10679 = vmatprep.subr.bf16.mxu1 %v13088_v29 }
 0x360   : > { %v12528_v42 = vpop.f32.mrb[0].mxu1 }
 0x361   : > { %v9961_v43 = vpop.f32.mrb[1].mxu1  ;;  %10163 = vmatmul.mubr.f32.vlgmr.msra.gmra.mrb[10].mxu1 %v12098_v30  ;;  %v12632_v24 = vmul.f32 %v12528_v42, %v12528_v42 }
 0x362   : > { %10681 = vmatpush3.bf16.msra.mxu1 %v12194_v23  ;;  %10169 = vmatprep.mubr.msk.f32.mxu1 %vm11315_vm1, %v13098_v7 }
 0x363   : > { %10682 = vmatprep.subr.bf16.mxu1 %v13088_v29 }
 0x369   : > { %10170 = vmatmul.mubr.f32.vlgmr.msra.gmra.mrb[10].mxu1 %v12098_v30 }
 0x36a   : > { %10684 = vmatpush3.bf16.msra.mxu1 %v12215_v54  ;;  %10176 = vmatprep.mubr.msk.f32.mxu1 %vm11315_vm1, %v13098_v7 }
 0x36b   : > { %10685 = vmatprep.subr.bf16.mxu1 %v13088_v29 }
 0x36d   : > { %10177 = vmatmul.mubr.f32.vlgmr.msra.gmra.mrb[12].mxu1 %v12115_v10 }
 0x36e   : > { %10687 = vmatpush3.bf16.msra.mxu1 %v12256_v53  ;;  %10183 = vmatprep.mubr.msk.f32.mxu1 %vm11315_vm1, %v13098_v7  ;;  %v13122_v53 = vld [vmem:[#allocation18_spill] sm:$0xff] }
 0x36f   : > { %10688 = vmatprep.subr.bf16.mxu1 %v13088_v29 }
 0x375   : > { %10184 = vmatmul.mubr.f32.vlgmr.msra.gmra.mrb[12].mxu1 %v12098_v30 }
 0x376   : > { %10690 = vmatpush3.bf16.msra.mxu1 %v13110_v49  ;;  %10190 = vmatprep.mubr.msk.f32.mxu1 %vm11315_vm1, %v13098_v7 }
 0x377   : > { %10691 = vmatprep.subr.bf16.mxu1 %v13088_v29 }
 0x37d   : > { %10191 = vmatmul.mubr.f32.vlgmr.msra.gmra.mrb[12].mxu1 %v12101_v31 }
 0x37e   : > { %10693 = vmatpush3.bf16.msra.mxu1 %v12215_v54  ;;  %10197 = vmatprep.mubr.msk.f32.mxu1 %vm11315_vm1, %v13098_v7 }
 0x37f   : > { %10694 = vmatprep.subr.bf16.mxu1 %v13088_v29 }
 0x385   : > { %10198 = vmatmul.mubr.f32.vlgmr.msra.gmra.mrb[12].mxu1 %v12104_v32 }
 0x386   : > { %10696 = vmatpush3.bf16.msra.mxu1 %v12239_v21  ;;  %10204 = vmatprep.mubr.msk.f32.mxu1 %vm11315_vm1, %v13098_v7  ;;  %v13120_v21 = vld [vmem:[#allocation12_spill] sm:$0xff] }
 0x387   : > { %10697 = vmatprep.subr.bf16.mxu1 %v13088_v29 }
 0x38c   : > { %v12562_v40 = vpop.f32.mrb[2].mxu1 }
 0x38d   : > { %v10003_v46 = vpop.f32.mrb[3].mxu1  ;;  %10205 = vmatmul.mubr.f32.vlgmr.msra.gmra.mrb[12].mxu1 %v12098_v30  ;;  %v12678_v19 = vmul.f32 %v12562_v40, %v12562_v40 }
 0x38e   : > { %10699 = vmatpush3.bf16.msra.mxu1 %v12215_v54  ;;  %10211 = vmatprep.mubr.msk.f32.mxu1 %vm11315_vm1, %v13098_v7 }
 0x38f   : > { %10700 = vmatprep.subr.bf16.mxu1 %v13088_v29 }
 0x395   : > { %10212 = vmatmul.mubr.f32.vlgmr.msra.gmra.mrb[12].mxu1 %v12098_v30 }
 0x396   : > { %10702 = vmatpush3.bf16.msra.mxu1 %v12231_v11  ;;  %10218 = vmatprep.mubr.msk.f32.mxu1 %vm11315_vm1, %v13098_v7 }
 0x397   : > { %10703 = vmatprep.subr.bf16.mxu1 %v13088_v29 }
 0x399   : > { %10219 = vmatmul.mubr.f32.vlgmr.msra.gmra.mrb[14].mxu1 %v12115_v10 }
 0x39a   : > { %10705 = vmatpush3.bf16.msra.mxu1 %v12272_v2  ;;  %10225 = vmatprep.mubr.msk.f32.mxu1 %vm11315_vm1, %v13098_v7 }
 0x39b   : > { %10706 = vmatprep.subr.bf16.mxu1 %v13088_v29 }
 0x3a1   : > { %10226 = vmatmul.mubr.f32.vlgmr.msra.gmra.mrb[14].mxu1 %v12098_v30 }
 0x3a2   : > { %10708 = vmatpush3.bf16.msra.mxu1 %v13111_v8  ;;  %10232 = vmatprep.mubr.msk.f32.mxu1 %vm11315_vm1, %v13098_v7 }
 0x3a3   : > { %10709 = vmatprep.subr.bf16.mxu1 %v13088_v29 }
 0x3a9   : > { %10233 = vmatmul.mubr.f32.vlgmr.msra.gmra.mrb[14].mxu1 %v12101_v31 }
 0x3aa   : > { %10711 = vmatpush3.bf16.msra.mxu1 %v12231_v11  ;;  %10239 = vmatprep.mubr.msk.f32.mxu1 %vm11315_vm1, %v13098_v7 }
 0x3ab   : > { %10712 = vmatprep.subr.bf16.mxu1 %v13088_v29 }
 0x3b1   : > { %10240 = vmatmul.mubr.f32.vlgmr.msra.gmra.mrb[14].mxu1 %v12104_v32 }
 0x3b2   : > { %10714 = vmatpush3.bf16.msra.mxu1 %v12259_v4  ;;  %10246 = vmatprep.mubr.msk.f32.mxu1 %vm11315_vm1, %v13098_v7  ;;  %v13118_v4 = vld [vmem:[#allocation21_spill] sm:$0xff] }
 0x3b3   : > { %10715 = vmatprep.subr.bf16.mxu1 %v13088_v29 }
 0x3b8   : > { %v12596_v20 = vpop.f32.mrb[4].mxu1 }
 0x3b9   : > { %v10045_v35 = vpop.f32.mrb[5].mxu1  ;;  %10247 = vmatmul.mubr.f32.vlgmr.msra.gmra.mrb[14].mxu1 %v12098_v30  ;;  %v12724_v43 = vmul.f32 %v12596_v20, %v12596_v20 }
 0x3ba   : > { %10717 = vmatpush3.bf16.msra.mxu1 %v12231_v11  ;;  %10253 = vmatprep.mubr.msk.f32.mxu1 %vm11315_vm1, %v13098_v7 }
 0x3bb   : > { %10718 = vmatprep.subr.bf16.mxu1 %v13088_v29 }
 0x3c1   : > { %10254 = vmatmul.mubr.f32.vlgmr.msra.gmra.mrb[14].mxu1 %v12098_v30 }
 0x3c2   : > { %10720 = vmatpush3.bf16.msra.mxu1 %v12252_v38  ;;  %10260 = vmatprep.mubr.msk.f32.mxu1 %vm11315_vm1, %v13098_v7 }
 0x3c3   : > { %10721 = vmatprep.subr.bf16.mxu1 %v13088_v29 }
 0x3c5   : > { %10261 = vmatmul.mubr.f32.vlgmr.msra.gmra.mrb[16].mxu1 %v12115_v10 }
 0x3c6   : > { %10723 = vmatpush3.bf16.msra.mxu1 %v13112_v47  ;;  %10267 = vmatprep.mubr.msk.f32.mxu1 %vm11315_vm1, %v13098_v7  ;;  %v13128_v47 = vld [vmem:[#allocation20_spill] sm:$0xff] }
 0x3c7   : > { %10724 = vmatprep.subr.bf16.mxu1 %v13088_v29 }
 0x3cd   : > { %10268 = vmatmul.mubr.f32.vlgmr.msra.gmra.mrb[16].mxu1 %v12098_v30 }
 0x3ce   : > { %10726 = vmatpush3.bf16.msra.mxu1 %v13115_v27  ;;  %10274 = vmatprep.mubr.msk.f32.mxu1 %vm11315_vm1, %v13098_v7 }
 0x3cf   : > { %10727 = vmatprep.subr.bf16.mxu1 %v13088_v29 }
 0x3d5   : > { %10275 = vmatmul.mubr.f32.vlgmr.msra.gmra.mrb[16].mxu1 %v12101_v31 }
 0x3d6   : > { %10729 = vmatpush3.bf16.msra.mxu1 %v12252_v38  ;;  %10281 = vmatprep.mubr.msk.f32.mxu1 %vm11315_vm1, %v13098_v7 }
 0x3d7   : > { %10730 = vmatprep.subr.bf16.mxu1 %v13088_v29 }
 0x3dd   : > { %10282 = vmatmul.mubr.f32.vlgmr.msra.gmra.mrb[16].mxu1 %v12104_v32 }
 0x3de   : > { %10732 = vmatpush3.bf16.msra.mxu1 %v13116_v12  ;;  %10288 = vmatprep.mubr.msk.f32.mxu1 %vm11315_vm1, %v13098_v7  ;;  %v13129_v12 = vld [vmem:[#allocation19_spill] sm:$0xff] }
 0x3df   : > { %10733 = vmatprep.subr.bf16.mxu1 %v13088_v29 }
 0x3e4   : > { %v3919_v23 = vpop.f32.mrb[6].mxu1 }
 0x3e5   : > { %v12634_v18 = vmul.f32 %v3919_v23, %v3919_v23  ;;  %v12637_v61 = vmul.f32 %v3919_v23, %v12528_v42  ;;  %v10087_v48 = vpop.f32.mrb[7].mxu1  ;;  %10289 = vmatmul.mubr.f32.vlgmr.msra.gmra.mrb[16].mxu1 %v12098_v30  ;;  %v13130_v23 = vld [vmem:[#allocation23_spill] sm:$0xff] }
 0x3e6   : > { %10735 = vmatpush3.bf16.msra.mxu1 %v12252_v38  ;;  %10295 = vmatprep.mubr.msk.f32.mxu1 %vm11315_vm1, %v13098_v7  ;;  %v13121_v38 = vpack.c.bf16 %v13119_v25, %v13120_v21  ;;  %v13131_v48 = vpack.c.bf16 %v13129_v12, %v13130_v23  ;;  %v9042_v23 = vlaneseq }
 0x3e7   : > { %v9014_v54 = vadd.f32 %v12634_v18, %v12632_v24  ;;  %10736 = vmatprep.subr.bf16.mxu1 %v13088_v29  ;;  %v9008_v1 = vmul.f32 2.0, %v12637_v61 }
 0x3e9   : > { %v9017_v60 = vadd.f32 0.0001, %v9014_v54  ;;  %v9011_v59 = vadd.f32 0.0001, %v9008_v1  ;;  %v13133_v1 = vld [vmem:[#allocation25_spill] sm:$0xff] }
 0x3eb   : > { %11198 = vrcp.f32 %v9017_v60 }
 0x3ed   : > { %10296 = vmatmul.mubr.f32.vlgmr.msra.gmra.mrb[16].mxu1 %v12098_v30 }
 0x3ee   : > { %10738 = vmatpush3.bf16.msra.mxu1 %v13117_v33  ;;  %10302 = vmatprep.mubr.msk.f32.mxu1 %vm11315_vm1, %v13098_v7 }
 0x3ef   : > { %10739 = vmatprep.subr.bf16.mxu1 %v13088_v29 }
 0x3f1   : > { %10303 = vmatmul.mubr.f32.vlgmr.msra.gmra.mrb[18].mxu1 %v12115_v10 }
 0x3f2   : > { %10741 = vmatpush3.bf16.msra.mxu1 %v13118_v4  ;;  %10309 = vmatprep.mubr.msk.f32.mxu1 %vm11315_vm1, %v13098_v7  ;;  %v13134_v4 = vld [vmem:[#allocation24_spill] sm:$0xff] }
 0x3f3   : > { %10742 = vmatprep.subr.bf16.mxu1 %v13088_v29 }
 0x3f5   : > { %v11199_v11 = vpop.eup %11198 }
 0x3f6   : > { %v12657_v52 = vmul.f32 %v11199_v11, %v9011_v59  ;;  %v13135_v59 = vld [vmem:[#allocation26_spill] sm:$0xff] }
 0x3f7   : > { %v13136_v11 = vpack.c.bf16 %v13134_v4, %v13135_v59 }
 0x3f9   : > { %10310 = vmatmul.mubr.f32.vlgmr.msra.gmra.mrb[18].mxu1 %v12098_v30 }
 0x3fa   : > { %10744 = vmatpush3.bf16.msra.mxu1 %v13121_v38  ;;  %10316 = vmatprep.mubr.msk.f32.mxu1 %vm11315_vm1, %v13098_v7  ;;  %v13138_v38 = vld [vmem:[#allocation28_spill] sm:$0xff] }
 0x3fb   : > { %10745 = vmatprep.subr.bf16.mxu1 %v13088_v29 }
 0x401   : > { %10317 = vmatmul.mubr.f32.vlgmr.msra.gmra.mrb[18].mxu1 %v12101_v31 }
 0x402   : > { %10747 = vmatpush3.bf16.msra.mxu1 %v13117_v33  ;;  %10323 = vmatprep.mubr.msk.f32.mxu1 %vm11315_vm1, %v13098_v7 }
 0x403   : > { %10748 = vmatprep.subr.bf16.mxu1 %v13088_v29 }
 0x409   : > { %10324 = vmatmul.mubr.f32.vlgmr.msra.gmra.mrb[18].mxu1 %v12104_v32 }
 0x40a   : > { %10750 = vmatpush3.bf16.msra.mxu1 %v13122_v53  ;;  %10330 = vmatprep.mubr.msk.f32.mxu1 %vm11315_vm1, %v13098_v7  ;;  %v13139_v53 = vpack.c.bf16 %v13138_v38, %v12349_v16 }
 0x40b   : > { %10751 = vmatprep.subr.bf16.mxu1 %v13088_v29 }
 0x410   : > { %v4378_v2 = vpop.f32.mrb[8].mxu1 }
 0x411   : > { %v12680_v6 = vmul.f32 %v4378_v2, %v4378_v2  ;;  %v12683_v39 = vmul.f32 %v4378_v2, %v12562_v40  ;;  %v10129_v34 = vpop.f32.mrb[9].mxu1  ;;  %10331 = vmatmul.mubr.f32.vlgmr.msra.gmra.mrb[18].mxu1 %v12098_v30 }
 0x412   : > { %10753 = vmatpush3.bf16.msra.mxu1 %v13117_v33  ;;  %10337 = vmatprep.mubr.msk.f32.mxu1 %vm11315_vm1, %v13098_v7 }
 0x413   : > { %v9015_v50 = vadd.f32 %v12680_v6, %v12678_v19  ;;  %10754 = vmatprep.subr.bf16.mxu1 %v13088_v29  ;;  %v9009_v22 = vmul.f32 2.0, %v12683_v39 }
 0x415   : > { %v9018_v37 = vadd.f32 0.0001, %v9015_v50  ;;  %v9012_v51 = vadd.f32 0.0001, %v9009_v22 }
 0x417   : > { %11200 = vrcp.f32 %v9018_v37 }
 0x419   : > { %10338 = vmatmul.mubr.f32.vlgmr.msra.gmra.mrb[18].mxu1 %v12098_v30 }
 0x41a   : > { %10756 = vmatpush3.bf16.msra.mxu1 %v13123_v55  ;;  %10344 = vmatprep.mubr.msk.f32.mxu1 %vm11315_vm1, %v13098_v7 }
 0x41b   : > { %10757 = vmatprep.subr.bf16.mxu1 %v13088_v29 }
 0x41d   : > { %10345 = vmatmul.mubr.f32.vlgmr.msra.gmra.mrb[20].mxu1 %v12115_v10 }
 0x41e   : > { %10759 = vmatpush3.bf16.msra.mxu1 %v12330_v56  ;;  %10351 = vmatprep.mubr.msk.f32.mxu1 %vm11315_vm1, %v13098_v7  ;;  %v13127_v56 = vld [vmem:[#allocation22_spill] sm:$0xff] }
 0x41f   : > { %10760 = vmatprep.subr.bf16.mxu1 %v13088_v29 }
 0x421   : > { %v11201_v45 = vpop.eup %11200 }
 0x422   : > { %v12703_v62 = vmul.f32 %v11201_v45, %v9012_v51 }
 0x425   : > { %10352 = vmatmul.mubr.f32.vlgmr.msra.gmra.mrb[20].mxu1 %v12098_v30 }
 0x426   : > { %10762 = vmatpush3.bf16.msra.mxu1 %v13126_v36  ;;  %10358 = vmatprep.mubr.msk.f32.mxu1 %vm11315_vm1, %v13098_v7 }
 0x427   : > { %10763 = vmatprep.subr.bf16.mxu1 %v13088_v29 }
 0x42d   : > { %10359 = vmatmul.mubr.f32.vlgmr.msra.gmra.mrb[20].mxu1 %v12101_v31 }
 0x42e   : > { %10765 = vmatpush3.bf16.msra.mxu1 %v13123_v55  ;;  %10365 = vmatprep.mubr.msk.f32.mxu1 %vm11315_vm1, %v13098_v7 }
 0x42f   : > { %10766 = vmatprep.subr.bf16.mxu1 %v13088_v29 }
 0x435   : > { %10366 = vmatmul.mubr.f32.vlgmr.msra.gmra.mrb[20].mxu1 %v12104_v32 }
 0x436   : > { %10768 = vmatpush3.bf16.msra.mxu1 %v13127_v56  ;;  %10372 = vmatprep.mubr.msk.f32.mxu1 %vm11315_vm1, %v13098_v7 }
 0x437   : > { %10769 = vmatprep.subr.bf16.mxu1 %v13088_v29 }
 0x43c   : > { %v4837_v42 = vpop.f32.mrb[10].mxu1 }
 0x43d   : > { %v12726_v49 = vmul.f32 %v4837_v42, %v4837_v42  ;;  %v12729_v40 = vmul.f32 %v4837_v42, %v12596_v20  ;;  %v10171_v46 = vpop.f32.mrb[11].mxu1  ;;  %10373 = vmatmul.mubr.f32.vlgmr.msra.gmra.mrb[20].mxu1 %v12098_v30 }
 0x43e   : > { %10771 = vmatpush3.bf16.msra.mxu1 %v13123_v55  ;;  %10379 = vmatprep.mubr.msk.f32.mxu1 %vm11315_vm1, %v13098_v7 }
 0x43f   : > { %v9016_v8 = vadd.f32 %v12726_v49, %v12724_v43  ;;  %10772 = vmatprep.subr.bf16.mxu1 %v13088_v29  ;;  %v9010_v20 = vmul.f32 2.0, %v12729_v40 }
 0x441   : > { %v9019_v35 = vadd.f32 0.0001, %v9016_v8  ;;  %v9013_v58 = vadd.f32 0.0001, %v9010_v20 }
 0x443   : > { %11202 = vrcp.f32 %v9019_v35 }
 0x445   : > { %10380 = vmatmul.mubr.f32.vlgmr.msra.gmra.mrb[20].mxu1 %v12098_v30 }
 0x446   : > { %10774 = vmatpush3.bf16.msra.mxu1 %v13128_v47  ;;  %10386 = vmatprep.mubr.msk.f32.mxu1 %vm11315_vm1, %v13098_v7 }
 0x447   : > { %10775 = vmatprep.subr.bf16.mxu1 %v13088_v29 }
 0x449   : > { %10387 = vmatmul.mubr.f32.vlgmr.msra.gmra.mrb[22].mxu1 %v12115_v10 }
 0x44a   : > { %10777 = vmatpush3.bf16.msra.mxu1 %v12351_v17  ;;  %10393 = vmatprep.mubr.msk.f32.mxu1 %vm11315_vm1, %v13098_v7  ;;  %v13132_v17 = vld [vmem:[#allocation27_spill] sm:$0xff] }
 0x44b   : > { %10778 = vmatprep.subr.bf16.mxu1 %v13088_v29 }
 0x44d   : > { %v11203_v5 = vpop.eup %11202 }
 0x44e   : > { %v12749_v27 = vmul.f32 %v11203_v5, %v9013_v58 }
 0x451   : > { %10394 = vmatmul.mubr.f32.vlgmr.msra.gmra.mrb[22].mxu1 %v12098_v30 }
 0x452   : > { %10780 = vmatpush3.bf16.msra.mxu1 %v13131_v48  ;;  %10400 = vmatprep.mubr.msk.f32.mxu1 %vm11315_vm1, %v13098_v7  ;;  %v9043_v48 = vand.u32 127, %v9042_v23 }
 0x453   : > { %10781 = vmatprep.subr.bf16.mxu1 %v13088_v29 }
 0x459   : > { %10401 = vmatmul.mubr.f32.vlgmr.msra.gmra.mrb[22].mxu1 %v12101_v31 }
 0x45a   : > { %10783 = vmatpush3.bf16.msra.mxu1 %v13128_v47  ;;  %10407 = vmatprep.mubr.msk.f32.mxu1 %vm11315_vm1, %v13098_v7 }
 0x45b   : > { %10784 = vmatprep.subr.bf16.mxu1 %v13088_v29 }
 0x461   : > { %10408 = vmatmul.mubr.f32.vlgmr.msra.gmra.mrb[22].mxu1 %v12104_v32 }
 0x462   : > { %10786 = vmatpush3.bf16.msra.mxu1 %v13132_v17  ;;  %10414 = vmatprep.mubr.msk.f32.mxu1 %vm11315_vm1, %v13098_v7  ;;  %v9045_v17 = vshrl.u32 %v9042_v23, 7 }
 0x463   : > { %10787 = vmatprep.subr.bf16.mxu1 %v13088_v29 }
 0x468   : > { %v12768_v54 = vpop.f32.mrb[12].mxu1 }
 0x469   : > { %v8981_v60 = vsub.f32 %v12768_v54, %v12632_v24  ;;  %v10213_v33 = vpop.f32.mrb[13].mxu1  ;;  %10415 = vmatmul.mubr.f32.vlgmr.msra.gmra.mrb[22].mxu1 %v12098_v30 }
 0x46a   : > { %10789 = vmatpush3.bf16.msra.mxu1 %v13128_v47  ;;  %10421 = vmatprep.mubr.msk.f32.mxu1 %vm11315_vm1, %v13098_v7 }
 0x46b   : > { %10790 = vmatprep.subr.bf16.mxu1 %v13088_v29 }
 0x471   : > { %10422 = vmatmul.mubr.f32.vlgmr.msra.gmra.mrb[22].mxu1 %v12098_v30 }
 0x472   : > { %10792 = vmatpush3.bf16.msra.mxu1 %v13133_v1  ;;  %10428 = vmatprep.mubr.msk.f32.mxu1 %vm11315_vm1, %v13098_v7 }
 0x473   : > { %10793 = vmatprep.subr.bf16.mxu1 %v13088_v29 }
 0x475   : > { %10429 = vmatmul.mubr.f32.vlgmr.msra.gmra.mrb[24].mxu1 %v12115_v10 }
 0x476   : > { %10795 = vmatpush3.bf16.msra.mxu1 %v12367_v3  ;;  %10435 = vmatprep.mubr.msk.f32.mxu1 %vm11315_vm1, %v13098_v7 }
 0x477   : > { %10796 = vmatprep.subr.bf16.mxu1 %v13088_v29 }
 0x47d   : > { %10436 = vmatmul.mubr.f32.vlgmr.msra.gmra.mrb[24].mxu1 %v12098_v30 }
 0x47e   : > { %10798 = vmatpush3.bf16.msra.mxu1 %v13136_v11  ;;  %10442 = vmatprep.mubr.msk.f32.mxu1 %vm11315_vm1, %v13098_v7 }
 0x47f   : > { %10799 = vmatprep.subr.bf16.mxu1 %v13088_v29 }
 0x485   : > { %10443 = vmatmul.mubr.f32.vlgmr.msra.gmra.mrb[24].mxu1 %v12101_v31 }
 0x486   : > { %10801 = vmatpush3.bf16.msra.mxu1 %v13133_v1  ;;  %10449 = vmatprep.mubr.msk.f32.mxu1 %vm11315_vm1, %v13098_v7 }
 0x487   : > { %10802 = vmatprep.subr.bf16.mxu1 %v13088_v29 }
 0x48d   : > { %10450 = vmatmul.mubr.f32.vlgmr.msra.gmra.mrb[24].mxu1 %v12104_v32 }
 0x48e   : > { %10804 = vmatpush3.bf16.msra.mxu1 %v12354_v13  ;;  %10456 = vmatprep.mubr.msk.f32.mxu1 %vm11315_vm1, %v13098_v7  ;;  %v13137_v13 = vld [vmem:[#allocation29_spill] sm:$0xff] }
 0x48f   : > { %10805 = vmatprep.subr.bf16.mxu1 %v13088_v29 }
 0x494   : > { %v12804_v3 = vpop.f32.mrb[14].mxu1 }
 0x495   : > { %v8982_v25 = vsub.f32 %v12804_v3, %v12678_v19  ;;  %v10255_v21 = vpop.f32.mrb[15].mxu1  ;;  %10457 = vmatmul.mubr.f32.vlgmr.msra.gmra.mrb[24].mxu1 %v12098_v30 }
 0x496   : > { %10807 = vmatpush3.bf16.msra.mxu1 %v13133_v1  ;;  %10463 = vmatprep.mubr.msk.f32.mxu1 %vm11315_vm1, %v13098_v7 }
 0x497   : > { %10808 = vmatprep.subr.bf16.mxu1 %v13088_v29 }
 0x49d   : > { %10464 = vmatmul.mubr.f32.vlgmr.msra.gmra.mrb[24].mxu1 %v12098_v30 }
 0x49e   : > { %10810 = vmatpush3.bf16.msra.mxu1 %v13137_v13  ;;  %10470 = vmatprep.mubr.msk.f32.mxu1 %vm11315_vm1, %v13098_v7 }
 0x49f   : > { %10811 = vmatprep.subr.bf16.mxu1 %v13088_v29 }
 0x4a1   : > { %10471 = vmatmul.mubr.f32.vlgmr.msra.gmra.mrb[26].mxu1 %v12115_v10 }
 0x4a2   : > { %10813 = vmatpush3.bf16.msra.mxu1 %v12386_v15  ;;  %10477 = vmatprep.mubr.msk.f32.mxu1 %vm11315_vm1, %v13098_v7 }
 0x4a3   : > { %10814 = vmatprep.subr.bf16.mxu1 %v13088_v29 }
 0x4a9   : > { %10478 = vmatmul.mubr.f32.vlgmr.msra.gmra.mrb[26].mxu1 %v12098_v30 }
 0x4aa   : > { %10816 = vmatpush3.bf16.msra.mxu1 %v13139_v53  ;;  %10484 = vmatprep.mubr.msk.f32.mxu1 %vm11315_vm1, %v13098_v7 }
 0x4ab   : > { %10817 = vmatprep.subr.bf16.mxu1 %v13088_v29 }
 0x4b1   : > { %10485 = vmatmul.mubr.f32.vlgmr.msra.gmra.mrb[26].mxu1 %v12101_v31 }
 0x4b2   : > { %10819 = vmatpush3.bf16.msra.mxu1 %v13137_v13  ;;  %10491 = vmatprep.mubr.msk.f32.mxu1 %vm11315_vm1, %v13098_v7 }
 0x4b3   : > { %10820 = vmatprep.subr.bf16.mxu1 %v13088_v29 }
 0x4b9   : > { %10492 = vmatmul.mubr.f32.vlgmr.msra.gmra.mrb[26].mxu1 %v12104_v32 }
 0x4ba   : > { %10822 = vmatpush3.bf16.msra.mxu1 %v12371_v28  ;;  %10498 = vmatprep.mubr.msk.f32.mxu1 %vm11315_vm1, %v13098_v7 }
 0x4bb   : > { %10823 = vmatprep.subr.bf16.mxu1 %v13088_v29 }
 0x4c0   : > { %v6214_v16 = vpop.f32.mrb[16].mxu1 }
 0x4c1   : > { %v8983_v15 = vsub.f32 %v6214_v16, %v12724_v43  ;;  %v10297_v2 = vpop.f32.mrb[17].mxu1  ;;  %10499 = vmatmul.mubr.f32.vlgmr.msra.gmra.mrb[26].mxu1 %v12098_v30 }
 0x4c2   : > { %10825 = vmatpush3.bf16.msra.mxu1 %v13137_v13  ;;  %10505 = vmatprep.mubr.msk.f32.mxu1 %vm11315_vm1, %v13098_v7 }
 0x4c3   : > { %10826 = vmatprep.subr.bf16.mxu1 %v13088_v29 }
 0x4c9   : > { %10506 = vmatmul.mubr.f32.vlgmr.msra.gmra.mrb[26].mxu1 %v12098_v30 }
 0x4ca   : > { %10828 = vmatpush3.bf16.msra.mxu1 %v12363_v41  ;;  %10512 = vmatprep.mubr.msk.f32.mxu1 %vm11315_vm1, %v13098_v7 }
 0x4cb   : > { %10829 = vmatprep.subr.bf16.mxu1 %v13088_v29 }
 0x4cd   : > { %10513 = vmatmul.mubr.f32.vlgmr.msra.gmra.mrb[28].mxu1 %v12115_v10 }
 0x4ce   : > { %10831 = vmatpush3.bf16.msra.mxu1 %v12388_v9  ;;  %10519 = vmatprep.mubr.msk.f32.mxu1 %vm11315_vm1, %v13098_v7 }
 0x4cf   : > { %10832 = vmatprep.subr.bf16.mxu1 %v13088_v29 }
 0x4d5   : > { %10520 = vmatmul.mubr.f32.vlgmr.msra.gmra.mrb[28].mxu1 %v12098_v30 }
 0x4d6   : > { %10834 = vmatpush3.bf16.msra.mxu1 %v10833_v63  ;;  %10526 = vmatprep.mubr.msk.f32.mxu1 %vm11315_vm1, %v13098_v7 }
 0x4d7   : > { %10835 = vmatprep.subr.bf16.mxu1 %v13088_v29 }
 0x4dd   : > { %10527 = vmatmul.mubr.f32.vlgmr.msra.gmra.mrb[28].mxu1 %v12101_v31 }
 0x4de   : > { %10837 = vmatpush3.bf16.msra.mxu1 %v12363_v41  ;;  %10533 = vmatprep.mubr.msk.f32.mxu1 %vm11315_vm1, %v13098_v7 }
 0x4df   : > { %10838 = vmatprep.subr.bf16.mxu1 %v13088_v29 }
 0x4e5   : > { %10534 = vmatmul.mubr.f32.vlgmr.msra.gmra.mrb[28].mxu1 %v12104_v32 }
 0x4e6   : > { %10840 = vmatpush3.bf16.msra.mxu1 %v12384_v57  ;;  %10540 = vmatprep.mubr.msk.f32.mxu1 %vm11315_vm1, %v13098_v7 }
 0x4e7   : > { %10841 = vmatprep.subr.bf16.mxu1 %v13088_v29 }
 0x4ec   : > { %v6673_v10 = vpop.f32.mrb[18].mxu1 }
 0x4ed   : > { %v8984_v26 = vsub.f32 %v6673_v10, %v12634_v18  ;;  %v10339_v31 = vpop.f32.mrb[19].mxu1  ;;  %10541 = vmatmul.mubr.f32.vlgmr.msra.gmra.mrb[28].mxu1 %v12098_v30 }
 0x4ee   : > { %10843 = vmatpush3.bf16.msra.mxu1 %v12363_v41  ;;  %10547 = vmatprep.mubr.msk.f32.mxu1 %vm11315_vm1, %v13098_v7 }
 0x4ef   : > { %v8996_v32 = vadd.f32 %v8984_v26, %v8981_v60  ;;  %v9046_v60 = vsub.s32 %v9043_v48, %v9045_v17 }
 0x4f1   : > { %v8999_v7 = vadd.f32 0.0009, %v8996_v32 }
 0x4f3   : > { %11204 = vrcp.f32 %v8999_v7 }
 0x4f5   : > { %10548 = vmatmul.mubr.f32.vlgmr.msra.gmra.mrb[28].mxu1 %v12098_v30 }
 0x4fd   : > { %v11205_v55 = vpop.eup %11204 }
 0x518   : > { %v7132_v0 = vpop.f32.mrb[20].mxu1 }
 0x519   : > { %v8985_v29 = vsub.f32 %v7132_v0, %v12680_v6  ;;  %v10381_v28 = vpop.f32.mrb[21].mxu1 }
 0x51b   : > { %v8997_v63 = vadd.f32 %v8985_v29, %v8982_v25 }
 0x51d   : > { %v9000_v51 = vadd.f32 0.0009, %v8997_v63 }
 0x51f   : > { %11206 = vrcp.f32 %v9000_v51 }
 0x544   : > { %v7591_v57 = vpop.f32.mrb[22].mxu1 }
 0x545   : > { %v8986_v41 = vsub.f32 %v7591_v57, %v12726_v49  ;;  %v10423_v9 = vpop.f32.mrb[23].mxu1 }
 0x547   : > { %v8998_v18 = vadd.f32 %v8986_v41, %v8983_v15 }
 0x549   : > { %v9001_v46 = vadd.f32 0.0009, %v8998_v18 }
 0x54b   : > { %11208 = vrcp.f32 %v9001_v46 }
 0x570   : > { %v8050_v34 = vpop.f32.mrb[24].mxu1 }
 0x571   : > { %v8987_v24 = vsub.f32 %v8050_v34, %v12637_v61  ;;  %v10465_v50 = vpop.f32.mrb[25].mxu1  ;;  %v11207_v61 = vpop.eup %11206 }
 0x572   : > { %v11209_v58 = vpop.eup %11208 }
 0x573   : > { %v8990_v30 = vmul.f32 2.0, %v8987_v24 }
 0x575   : > { %v8993_v37 = vadd.f32 0.0009, %v8990_v30 }
 0x577   : > { %v9003_v6 = vmul.f32 %v11205_v55, %v8993_v37 }
 0x579   : > { %v9026_v22 = vmul.f32 %v12657_v52, %v9003_v6 }
 0x57b   : > { %v9030_v19 = vsel %vm9029_vm2, %v9026_v22, 0.0 }
 0x57c   : > { %9031 = vadd.xlane.f32.xlu0 %v9030_v19 }
 0x59c   : > { %v8509_v45 = vpop.f32.mrb[26].mxu1 }
 0x59d   : > { %v8988_v44 = vsub.f32 %v8509_v45, %v12683_v39  ;;  %v10507_v14 = vpop.f32.mrb[27].mxu1 }
 0x59f   : > { %v8991_v36 = vmul.f32 2.0, %v8988_v44 }
 0x5a1   : > { %v8994_v56 = vadd.f32 0.0009, %v8991_v36 }
 0x5a3   : > { %v9005_v42 = vmul.f32 %v11207_v61, %v8994_v56 }
 0x5a5   : > { %v9027_v43 = vmul.f32 %v12703_v62, %v9005_v42 }
 0x5a7   : > { %v9033_v49 = vsel %vm9029_vm2, %v9027_v43, 0.0 }
 0x5a8   : > { %9034 = vadd.xlane.f32.xlu0 %v9033_v49 }
 0x5c8   : > { %v8968_v52 = vpop.f32.mrb[28].mxu1 }
 0x5c9   : > { %v8989_v8 = vsub.f32 %v8968_v52, %v12729_v40  ;;  %v10549_v35 = vpop.f32.mrb[29].mxu1 }
 0x5cb   : > { %v8992_v47 = vmul.f32 2.0, %v8989_v8 }
 0x5cd   : > { %v8995_v20 = vadd.f32 0.0009, %v8992_v47 }
 0x5cf   : > { %v9007_v39 = vmul.f32 %v11209_v58, %v8995_v20 }
 0x5d1   : > { %v9028_v5 = vmul.f32 %v12749_v27, %v9007_v39 }
 0x5d3   : > { %v9036_v12 = vsel %vm9029_vm2, %v9028_v5, 0.0 }
 0x5d4   : > { %9037 = vadd.xlane.f32.xlu1 %v9036_v12 }
 0x609   : > { %v9032_v62 = vpop.xlane.xlu0 %9031 }
 0x60a   : > { %v9047_v40 = vrot.slane %v9032_v62, %v9046_v60 }
 0x635   : > { %v9035_v54 = vpop.xlane.xlu0 %9034 }
 0x636   : > { %v9051_v33 = vrot.slane %v9035_v54, %v9046_v60 }
 0x638   : > { %v9057_v59 = vsel %vm9056_vm3, %v9051_v33, %v9047_v40 }
 0x661   : > { %v9038_v1 = vpop.xlane.xlu1 %9037 }
 0x662   : > { %v9055_v4 = vrot.slane %v9038_v1, %v9046_v60 }
 0x664   : > { %v9059_v27 = vsel %vm9058_vm4, %v9055_v4, %v9057_v59 }
 0x665   : > { %v9062_v11 = vsel %vm9061_vm5, %v9059_v27, 0.0 }
 0x666   : > { %9063 = vadd.xlane.f32.xlu1 %v9062_v11 }
 0x6f3   : > { %v9064_v3 = vpop.xlane.xlu1 %9063 }
 0x6f4   : > { %v9065_v25 = vmul.f32 0.027777778, %v9064_v3 }
 0x6f6   : > { %v9070_v21 = vrot.slane %v9065_v25, %v9046_v60 }
 0x6f8   : > { %9073 = vst.msk [vmem:[%s253_s8] sm:$0x1] %vm9072_vm6, %v9070_v21 }
 0x6f9 PF: > { %p17_p11 = scmp.ge.s32.totalorder %s11364_s20, 4   ;;  %s13140_s15 = smov %s11300_s16 }
 0x6fa   : > { %s13141_s16 = smov %s11304_s17  ;;  %s13142_s17 = smov %s11374_s23 }
 0x6fb   : > { %s13143_s18 = smov %s11364_s20  ;;  %19 = sbr.rel (!%p17_p11) target bundleno = 5 (0x5), region = 89 }
 0x702   :  { %9091 = vsyncpa [#allocation3], 1 }
 0x703   :  { %9093 = vsyncpa [#allocation3 + $0x1], 1 }
 0x704   :  { %9094 = vsyncpa [#allocation5], 1 }
 0x705   :  { %9096 = vsyncpa [#allocation5 + $0x1], 1 }

</bundles_post_ra>
